<compile_context>
chip_gen: v7x
topology: tpu7x:2x2x1
jax: 0.10.0
libtpu: 0.0.40
codegen_flags: <defaults>
</compile_context>

<pallas_src>
import functools

import jax
import jax.numpy as jnp
from jax.experimental import pallas as pl
from jax.experimental.pallas import tpu as pltpu


def _conv_kernel_fused(x_ref, w_ref, o_ref, col_ref, *, KH, KW):
    """Small-Cin path: im2col the tile once, a single fused MXU matmul.

    x_ref:   (Hp, Wp, Cin)        padded input, resident per batch element
    w_ref:   (KH*KW*Cin, TC)      tap-major weight matrix (Cout tile)
    o_ref:   (TH, OW, TC)         output row tile (lane-dense TC)
    col_ref: (TH*OW, KH*KW*Cin)   im2col scratch for this tile
    """
    TH, OW, TC = o_ref.shape
    Cin = x_ref.shape[-1]
    h0 = pl.multiple_of(pl.program_id(2) * TH, TH)
    # Rows needed for this output tile, including the KH-1 halo.
    xin = x_ref[pl.ds(h0, TH + KH - 1), :, :]                    # (TH+KH-1, Wp, Cin)

    for kh in range(KH):
        for kw in range(KW):
            tap = kh * KW + kw
            col_ref[:, tap * Cin:(tap + 1) * Cin] = (
                xin[kh:kh + TH, kw:kw + OW, :].reshape(TH * OW, Cin))

    acc = jnp.dot(col_ref[...], w_ref[...], preferred_element_type=jnp.float32)
    o_ref[...] = acc.reshape(TH, OW, TC).astype(o_ref.dtype)


def _conv_kernel_pertap(x_ref, w_ref, o_ref, *, KH, KW):
    """Large-Cin path: per-tap matmuls, accumulated in registers.

    x_ref: (Hp, Wp, Cin)
    w_ref: (KH*KW, Cin, TC)   leading-dim tap index (free, no sublane offsets)
    o_ref: (TH, OW, TC)
    """
    TH, OW, TC = o_ref.shape
    Cin = x_ref.shape[-1]
    h0 = pl.multiple_of(pl.program_id(2) * TH, TH)
    xin = x_ref[pl.ds(h0, TH + KH - 1), :, :]                    # (TH+KH-1, Wp, Cin)

    acc = jnp.zeros((TH * OW, TC), jnp.float32)
    for kh in range(KH):
        for kw in range(KW):
            tap = kh * KW + kw
            pm = xin[kh:kh + TH, kw:kw + OW, :].reshape(TH * OW, Cin)
            acc = acc + jnp.dot(pm, w_ref[tap],
                                preferred_element_type=jnp.float32)
    o_ref[...] = acc.reshape(TH, OW, TC).astype(o_ref.dtype)


def all_conv2d(x_nchw, weight_oihw, stride=1, padding=1, compute_dtype=None,
               max_row_tile=16):
    """Matches torch.nn.functional.conv2d(x, w, bias=None, stride, padding)."""
    # TODO(synk): only stride=1 (the module default) is implemented in-kernel.
    assert stride == 1, "only stride=1 (module default) implemented"
    N, Cin, H, W = x_nchw.shape
    Cout, Cin_w, KH, KW = weight_oihw.shape
    assert Cin == Cin_w
    OH = H + 2 * padding - KH + 1
    OW = W + 2 * padding - KW + 1

    # TODO(synk): pass compute_dtype=jnp.bfloat16 on v6e/v7x for the fast MXU
    # path (accumulation stays f32 via preferred_element_type). Default keeps
    # the input dtype so numerics match F.conv2d exactly for the f32 test.
    cdtype = x_nchw.dtype if compute_dtype is None else jnp.dtype(compute_dtype)
    out_dtype = x_nchw.dtype

    # Lane-dense output: pad Cout up to a multiple of 128 and tile it at 128.
    LANE = 128
    Cout_pad = ((Cout + LANE - 1) // LANE) * LANE
    TC = LANE

    # Glue (plain JAX): layout conversion, zero padding, weight re-layout.
    x_nhwc = jnp.transpose(x_nchw, (0, 2, 3, 1)).astype(cdtype)
    x_pad = jnp.pad(x_nhwc,
                    ((0, 0), (padding, padding), (padding, padding), (0, 0)))
    Hp, Wp = x_pad.shape[1], x_pad.shape[2]

    # (Cout, Cin, KH, KW) -> (KH, KW, Cin, Cout_pad)
    w = jnp.transpose(weight_oihw, (2, 3, 1, 0)).astype(cdtype)
    w = jnp.pad(w, ((0, 0), (0, 0), (0, 0), (0, Cout_pad - Cout)))

    fuse_taps = KH * KW * Cin <= 256
    if fuse_taps:
        w_mat = w.reshape(KH * KW * Cin, Cout_pad)
        w_spec = pl.BlockSpec((KH * KW * Cin, TC), lambda n, ct, ht: (0, ct))
    else:
        w_mat = w.reshape(KH * KW, Cin, Cout_pad)
        w_spec = pl.BlockSpec((KH * KW, Cin, TC), lambda n, ct, ht: (0, 0, ct))

    # Row tile: largest divisor of OH <= max_row_tile whose per-tile buffers fit
    # a conservative budget (sized for v7x's 64 MiB / 32 MiB-scoped VMEM).
    itemsize = jnp.dtype(cdtype).itemsize
    out_itemsize = jnp.dtype(out_dtype).itemsize
    tile_budget = 8 << 20
    TH = 1
    for th in range(1, OH + 1):
        if OH % th or th > max_row_tile:
            continue
        tile_bytes = (2 * th * OW * TC * out_itemsize          # double-buffered out
                      + th * OW * KH * KW * Cin * itemsize     # im2col scratch
                      + th * OW * TC * 4)                      # f32 accumulator
        if tile_bytes <= tile_budget:
            TH = th
    HT, CT = OH // TH, Cout_pad // TC

    kernel = (functools.partial(_conv_kernel_fused, KH=KH, KW=KW) if fuse_taps
              else functools.partial(_conv_kernel_pertap, KH=KH, KW=KW))
    scratch = ([pltpu.VMEM((TH * OW, KH * KW * Cin), cdtype)] if fuse_taps
               else [])

    # VMEM budget derived from the chosen tiles (clamped to v7x's 64 MiB).
    vmem_need = (2 * Hp * Wp * Cin * itemsize            # resident padded input
                 + 2 * KH * KW * Cin * TC * itemsize     # weight tile
                 + 2 * TH * OW * TC * out_itemsize       # output tile
                 + TH * OW * KH * KW * Cin * itemsize    # im2col scratch
                 + (4 << 20))                            # headroom
    vmem_limit = int(min(max(vmem_need, 16 << 20), 64 << 20))

    flops = 2 * N * OH * OW * Cout * KH * KW * Cin
    bytes_accessed = (x_pad.size * itemsize + w_mat.size * itemsize
                      + N * OH * OW * Cout_pad * out_itemsize)

    # TODO(synk): once supported everywhere, pin the tiny weight block with
    # pipeline_mode=pl.Buffered(1) to save a VMEM buffer.
    out_nhwc = pl.pallas_call(
        kernel,
        out_shape=jax.ShapeDtypeStruct((N, OH, OW, Cout_pad), out_dtype),
        grid=(N, CT, HT),
        in_specs=[
            # Padded input: resident across the row/Cout axes (index ignores them).
            pl.BlockSpec((None, Hp, Wp, Cin), lambda n, ct, ht: (n, 0, 0, 0)),
            w_spec,
        ],
        out_specs=pl.BlockSpec((None, TH, OW, TC),
                               lambda n, ct, ht: (n, ht, 0, ct)),
        scratch_shapes=scratch,
        compiler_params=pltpu.CompilerParams(
            dimension_semantics=("parallel", "parallel", "parallel"),
            vmem_limit_bytes=vmem_limit),
        cost_estimate=pl.CostEstimate(flops=flops, transcendentals=0,
                                      bytes_accessed=bytes_accessed),
    )(x_pad, w_mat)

    out = out_nhwc[..., :Cout]                      # drop Cout padding
    return jnp.transpose(out, (0, 3, 1, 2))         # back to NCHW


if __name__ == "__main__":
    key = jax.random.PRNGKey(0)
    kx, kw = jax.random.split(key)

    # Case 1: module-default small shapes (exercises the fused small-Cin path).
    N, Cin, Cout, H, W, K = 2, 4, 8, 16, 16, 3
    x = jax.random.normal(kx, (N, Cin, H, W), dtype=jnp.float32)
    # kaiming_normal_(mode='fan_out', nonlinearity='relu'): std = sqrt(2/(Cout*K*K))
    fan_out = Cout * K * K
    weight = jax.random.normal(kw, (Cout, Cin, K, K), dtype=jnp.float32) * jnp.sqrt(
        2.0 / fan_out)

    out = jax.block_until_ready(all_conv2d(x, weight, stride=1, padding=1))
    ref = jax.lax.conv_general_dilated(
        x, weight, window_strides=(1, 1), padding=((1, 1), (1, 1)),
        dimension_numbers=("NCHW", "OIHW", "NCHW"),
        precision=jax.lax.Precision.HIGHEST)
    assert out.shape == tuple(ref.shape) == (N, Cout, H, W)
    assert jnp.allclose(out, ref, atol=1e-4, rtol=1e-4)

    # Case 2: larger channels / rows (exercises the per-tap path, multiple
    # output-row tiles, and Cout padding to the 128-lane boundary).
    k3, k4 = jax.random.split(kw)
    N2, Cin2, Cout2, H2, W2 = 1, 32, 40, 32, 32
    x2 = jax.random.normal(k3, (N2, Cin2, H2, W2), dtype=jnp.float32)
    w2 = jax.random.normal(k4, (Cout2, Cin2, K, K), dtype=jnp.float32) * jnp.sqrt(
        2.0 / (Cout2 * K * K))
    out2 = jax.block_until_ready(all_conv2d(x2, w2, stride=1, padding=1))
    ref2 = jax.lax.conv_general_dilated(
        x2, w2, window_strides=(1, 1), padding=((1, 1), (1, 1)),
        dimension_numbers=("NCHW", "OIHW", "NCHW"),
        precision=jax.lax.Precision.HIGHEST)
    assert out2.shape == tuple(ref2.shape) == (N2, Cout2, H2, W2)
    assert jnp.allclose(out2, ref2, atol=2e-3, rtol=2e-3)

    print("KERNEL_OK")
</pallas_src>

<mosaic_0001>
module attributes {stable_mosaic.version = 11 : i64} {
  func.func @_conv_kernel_fused(%arg0: i32, %arg1: i32, %arg2: i32, %arg3: memref<1x18x18x4xf32, #tpu.memory_space<vmem>>, %arg4: memref<36x128xf32, #tpu.memory_space<vmem>>, %arg5: memref<1x16x16x128xf32, #tpu.memory_space<vmem>>, %arg6: memref<256x36xf32, #tpu.memory_space<vmem>>) attributes {dimension_semantics = [#tpu.dimension_semantics<parallel>, #tpu.dimension_semantics<parallel>, #tpu.dimension_semantics<parallel>], iteration_bounds = array<i64: 2, 1, 1>, scalar_prefetch = 0 : i64, scratch_operands = 1 : i64, tpu.core_type = #tpu.core_type<tc>, window_params = [{transform_indices = @transform_0, window_bounds = array<i64: 1, 18, 18, 4>}, {transform_indices = @transform_1, window_bounds = array<i64: 36, 128>}, {transform_indices = @transform_2, window_bounds = array<i64: 1, 16, 16, 128>}]} {
    %c16_i32 = arith.constant 16 : i32
    %0 = arith.muli %arg2, %c16_i32 : i32
    %1 = tpu.assume_multiple %0, 16 : i32
    %c0 = arith.constant 0 : index
    %2 = arith.index_cast %1 : i32 to index
    %c0_0 = arith.constant 0 : index
    %c0_1 = arith.constant 0 : index
    %3 = vector.load %arg3[%c0, %2, %c0_0, %c0_1] : memref<1x18x18x4xf32, #tpu.memory_space<vmem>>, vector<1x18x18x4xf32>
    %4 = vector.shape_cast %3 : vector<1x18x18x4xf32> to vector<18x18x4xf32>
    %5 = vector.extract_strided_slice %4 {offsets = [0, 0, 0], sizes = [16, 16, 4], strides = [1, 1, 1]} : vector<18x18x4xf32> to vector<16x16x4xf32>
    %6 = vector.shape_cast %5 : vector<16x16x4xf32> to vector<256x4xf32>
    %c0_2 = arith.constant 0 : index
    %c0_3 = arith.constant 0 : index
    %7 = vector.load %arg6[%c0_2, %c0_3] : memref<256x36xf32, #tpu.memory_space<vmem>>, vector<256x4xf32>
    tpu.vector_store %arg6[%c0_2, %c0_3], %6 {strides = array<i32>} : memref<256x36xf32, #tpu.memory_space<vmem>>, vector<256x4xf32>,
    %8 = vector.extract_strided_slice %4 {offsets = [0, 1, 0], sizes = [16, 16, 4], strides = [1, 1, 1]} : vector<18x18x4xf32> to vector<16x16x4xf32>
    %9 = vector.shape_cast %8 : vector<16x16x4xf32> to vector<256x4xf32>
    %c0_4 = arith.constant 0 : index
    %c4 = arith.constant 4 : index
    %10 = vector.load %arg6[%c0_4, %c4] : memref<256x36xf32, #tpu.memory_space<vmem>>, vector<256x4xf32>
    tpu.vector_store %arg6[%c0_4, %c4], %9 {strides = array<i32>} : memref<256x36xf32, #tpu.memory_space<vmem>>, vector<256x4xf32>,
    %11 = vector.extract_strided_slice %4 {offsets = [0, 2, 0], sizes = [16, 16, 4], strides = [1, 1, 1]} : vector<18x18x4xf32> to vector<16x16x4xf32>
    %12 = vector.shape_cast %11 : vector<16x16x4xf32> to vector<256x4xf32>
    %c0_5 = arith.constant 0 : index
    %c8 = arith.constant 8 : index
    %13 = vector.load %arg6[%c0_5, %c8] : memref<256x36xf32, #tpu.memory_space<vmem>>, vector<256x4xf32>
    tpu.vector_store %arg6[%c0_5, %c8], %12 {strides = array<i32>} : memref<256x36xf32, #tpu.memory_space<vmem>>, vector<256x4xf32>,
    %14 = vector.extract_strided_slice %4 {offsets = [1, 0, 0], sizes = [16, 16, 4], strides = [1, 1, 1]} : vector<18x18x4xf32> to vector<16x16x4xf32>
    %15 = vector.shape_cast %14 : vector<16x16x4xf32> to vector<256x4xf32>
    %c0_6 = arith.constant 0 : index
    %c12 = arith.constant 12 : index
    %16 = vector.load %arg6[%c0_6, %c12] : memref<256x36xf32, #tpu.memory_space<vmem>>, vector<256x4xf32>
    tpu.vector_store %arg6[%c0_6, %c12], %15 {strides = array<i32>} : memref<256x36xf32, #tpu.memory_space<vmem>>, vector<256x4xf32>,
    %17 = vector.extract_strided_slice %4 {offsets = [1, 1, 0], sizes = [16, 16, 4], strides = [1, 1, 1]} : vector<18x18x4xf32> to vector<16x16x4xf32>
    %18 = vector.shape_cast %17 : vector<16x16x4xf32> to vector<256x4xf32>
    %c0_7 = arith.constant 0 : index
    %c16 = arith.constant 16 : index
    %19 = vector.load %arg6[%c0_7, %c16] : memref<256x36xf32, #tpu.memory_space<vmem>>, vector<256x4xf32>
    tpu.vector_store %arg6[%c0_7, %c16], %18 {strides = array<i32>} : memref<256x36xf32, #tpu.memory_space<vmem>>, vector<256x4xf32>,
    %20 = vector.extract_strided_slice %4 {offsets = [1, 2, 0], sizes = [16, 16, 4], strides = [1, 1, 1]} : vector<18x18x4xf32> to vector<16x16x4xf32>
    %21 = vector.shape_cast %20 : vector<16x16x4xf32> to vector<256x4xf32>
    %c0_8 = arith.constant 0 : index
    %c20 = arith.constant 20 : index
    %22 = vector.load %arg6[%c0_8, %c20] : memref<256x36xf32, #tpu.memory_space<vmem>>, vector<256x4xf32>
    tpu.vector_store %arg6[%c0_8, %c20], %21 {strides = array<i32>} : memref<256x36xf32, #tpu.memory_space<vmem>>, vector<256x4xf32>,
    %23 = vector.extract_strided_slice %4 {offsets = [2, 0, 0], sizes = [16, 16, 4], strides = [1, 1, 1]} : vector<18x18x4xf32> to vector<16x16x4xf32>
    %24 = vector.shape_cast %23 : vector<16x16x4xf32> to vector<256x4xf32>
    %c0_9 = arith.constant 0 : index
    %c24 = arith.constant 24 : index
    %25 = vector.load %arg6[%c0_9, %c24] : memref<256x36xf32, #tpu.memory_space<vmem>>, vector<256x4xf32>
    tpu.vector_store %arg6[%c0_9, %c24], %24 {strides = array<i32>} : memref<256x36xf32, #tpu.memory_space<vmem>>, vector<256x4xf32>,
    %26 = vector.extract_strided_slice %4 {offsets = [2, 1, 0], sizes = [16, 16, 4], strides = [1, 1, 1]} : vector<18x18x4xf32> to vector<16x16x4xf32>
    %27 = vector.shape_cast %26 : vector<16x16x4xf32> to vector<256x4xf32>
    %c0_10 = arith.constant 0 : index
    %c28 = arith.constant 28 : index
    %28 = vector.load %arg6[%c0_10, %c28] : memref<256x36xf32, #tpu.memory_space<vmem>>, vector<256x4xf32>
    tpu.vector_store %arg6[%c0_10, %c28], %27 {strides = array<i32>} : memref<256x36xf32, #tpu.memory_space<vmem>>, vector<256x4xf32>,
    %29 = vector.extract_strided_slice %4 {offsets = [2, 2, 0], sizes = [16, 16, 4], strides = [1, 1, 1]} : vector<18x18x4xf32> to vector<16x16x4xf32>
    %30 = vector.shape_cast %29 : vector<16x16x4xf32> to vector<256x4xf32>
    %c0_11 = arith.constant 0 : index
    %c32 = arith.constant 32 : index
    %31 = vector.load %arg6[%c0_11, %c32] : memref<256x36xf32, #tpu.memory_space<vmem>>, vector<256x4xf32>
    tpu.vector_store %arg6[%c0_11, %c32], %30 {strides = array<i32>} : memref<256x36xf32, #tpu.memory_space<vmem>>, vector<256x4xf32>,
    %c0_12 = arith.constant 0 : index
    %c0_13 = arith.constant 0 : index
    %32 = vector.load %arg6[%c0_12, %c0_13] : memref<256x36xf32, #tpu.memory_space<vmem>>, vector<256x36xf32>
    %c0_14 = arith.constant 0 : index
    %c0_15 = arith.constant 0 : index
    %33 = vector.load %arg4[%c0_14, %c0_15] : memref<36x128xf32, #tpu.memory_space<vmem>>, vector<36x128xf32>
    %cst = arith.constant dense<0.000000e+00> : vector<256x128xf32>
    %34 = tpu.matmul %32, %33, %cst {dimension_numbers = #tpu.dot_dimension_numbers<[1], [0], [0], [1], [0, 0, 1, 1], [], []>} : vector<256x36xf32>, vector<36x128xf32>, vector<256x128xf32> -> vector<256x128xf32>
    %35 = vector.shape_cast %34 : vector<256x128xf32> to vector<16x16x128xf32>
    %c0_16 = arith.constant 0 : index
    %c0_17 = arith.constant 0 : index
    %c0_18 = arith.constant 0 : index
    %c0_19 = arith.constant 0 : index
    %36 = vector.load %arg5[%c0_16, %c0_17, %c0_18, %c0_19] : memref<1x16x16x128xf32, #tpu.memory_space<vmem>>, vector<1x16x16x128xf32>
    %37 = vector.shape_cast %36 : vector<1x16x16x128xf32> to vector<16x16x128xf32>
    %38 = vector.shape_cast %35 : vector<16x16x128xf32> to vector<1x16x16x128xf32>
    tpu.vector_store %arg5[%c0_16, %c0_17, %c0_18, %c0_19], %38 {strides = array<i32>} : memref<1x16x16x128xf32, #tpu.memory_space<vmem>>, vector<1x16x16x128xf32>,
    return
  }
  func.func @transform_0(%arg0: i32, %arg1: i32, %arg2: i32) -> (i32, i32, i32, i32) {
    %c0_i32 = arith.constant 0 : i32
    %c0_i32_0 = arith.constant 0 : i32
    %c0_i32_1 = arith.constant 0 : i32
    %c0_i32_2 = arith.constant 0 : i32
    return %arg0, %c0_i32, %c0_i32_0, %c0_i32_1 : i32, i32, i32, i32
  }
  func.func @transform_1(%arg0: i32, %arg1: i32, %arg2: i32) -> (i32, i32) {
    %c0_i32 = arith.constant 0 : i32
    %c0_i32_0 = arith.constant 0 : i32
    return %c0_i32, %arg1 : i32, i32
  }
  func.func @transform_2(%arg0: i32, %arg1: i32, %arg2: i32) -> (i32, i32, i32, i32) {
    %c0_i32 = arith.constant 0 : i32
    %c0_i32_0 = arith.constant 0 : i32
    return %arg0, %arg2, %c0_i32, %arg1 : i32, i32, i32, i32
  }
}

</mosaic_0001>

<bundles_post_ra>
// kernel: tpu_custom_call.1
= control target key start
LH: loop header
LB: loop body
LE: loop exit
PB: predicated region body
PF: predicated region fallthrough
CT: control target
= control target key end

     0   :  { %7 = vsyncpa [#allocation4], 0  ;;  %s3838_s0 = inlined_call_operand.vmem [shape: f32[2,18,18,4], index: 0, kind: input, shape index: {}]   ;;  %s3839_s1 = inlined_call_operand.vmem [shape: f32[36,128], index: 1, kind: input, shape index: {}]   ;;  %s3840_s2 = inlined_call_operand.hbm [shape: f32[2,16,16,128], index: 2, kind: output, shape index: {}]  }
   0x1   :  { %9 = vsyncpa [#allocation4 + $0x1], 0  ;;  %s2374_s9 = smov 0   ;;  %s2376_s10 = smov 0  }
   0x2   :  { %s2378_s11 = smov 0   ;;  %s2380_s12 = smov 0  }
   0x3   :  { %s2382_s13 = smov 0   ;;  %s2384_s14 = smov 0  }
   0x4 LB: > { %s2048_s15 = sadd.s32 4294967295, %s2347_s14   ;;  %s2049_s16 = sadd.s32 4294967294, %s2347_s14   ;;  %s2347_s14 = sphi %s2384_s14, %s15_s14   ;;  %s2343_s13 = sphi %s2382_s13, %s3979_s13   ;;  %s2339_s12 = sphi %s2380_s12, %s3978_s12   ;;  %s2335_s11 = sphi %s2378_s11, %s3977_s11   ;;  %s2331_s10 = sphi %s2376_s10, %s3976_s10   ;;  %s2327_s9 = sphi %s2374_s9, %s3975_s9  }
   0x5   : > { %s34_s17 = sadd.s32 1, %s2343_s13  ;;  %s97_s18 = sadd.s32 1, %s2335_s11 }
   0x6   : > { %p36_p0 = scmp.ge.s32.totalorder %s34_s17, 2  ;;  %p107_p1 = scmp.ne.s32.totalorder %s2335_s11, %s2331_s10 }
   0x7   : > { %p108_p2 = scmp.eq.s32.totalorder %s2048_s15, 1  ;;  %p113_p3 = scmp.ne.s32.totalorder %s2331_s10, %s2327_s9 }
   0x8   : > { %s3981_s17 = smov (%p36_p0, %s34_s17), 0  ;;  %p114_p5 = scmp.eq.s32.totalorder %s2049_s16, 1 }
   0x9   : > { %p2414_p4 = por %p108_p2, %p107_p1  ;;  %s90_s20 = ssub.s32 %s2343_s13, %s3981_s17 }
   0xa   : > { %p2053_p6 = scmp.ge.s32.totalorder %s2347_s14, 1  ;;  %p95_p7 = scmp.eq.s32.totalorder %s90_s20, 0 }
   0xb   : > { %p2421_p8 = por %p114_p5, %p113_p3  ;;  %p147_p9 = scmp.lt.s32.totalorder %s2347_s14, 3 }
   0xc   : > { %s2427_s22 = scalar_select %p95_p7, %s2335_s11, %s97_s18  }
   0xd   : > { %p148_p10 = pnand %p2053_p6, %p147_p9 }
   0xf   : > { %151 = sbr.rel (%p148_p10) target bundleno = 893 (0x37d), region = 28 }
  0x16   : > { %p173_p11 = scmp.lt.s32.totalorder %s2339_s12, 1  ;;  %vm240_vm0 = vcmask 31744   ;;  %vm321_vm1 = vcmask 1046528   ;;  %s2349_s28 = smov 4   ;;  %vm531_vm2 = vcmask 1045504   ;;  %vm498_vm3 = vcmask 64544  }
  0x17   : > { %s2350_s29 = smov 8   ;;  %s2351_s30 = smov 12   ;;  %vm708_vm4 = vcmask 97344   ;;  %vm1675_vm5 = vcmask 1043456   ;;  %vm839_vm6 = vcmask 130144   ;;  %vm974_vm7 = vcmask 162944  }
  0x18   : > { %s174_s23 = scalar_select %p173_p11, %s2339_s12, 1  ;;  %vm1108_vm8 = vcmask 195744   ;;  %vm1239_vm9 = vcmask 228544   ;;  %vm1374_vm10 = vcmask 261344   ;;  %vm1508_vm11 = vcmask 294144  }
  0x19   : > { %s2352_s3 = smov 16   ;;  %s2353_s4 = smov 20   ;;  %vm1578_vm12 = vcmask 293888  }
  0x1a   : > { %s2204_s24 = smul.u32 432, %s174_s23  ;;  %s2354_s5 = smov 24  }
  0x1b   : > { %s2355_s6 = smov 28   ;;  %s2356_s25 = smov 32  }
  0x1c   : > { %s2434_s27 = scalar_lea.vmem %s3838_s0, %s2204_s24  ;;  %s2357_s16 = smov [#allocation3]  }
  0x1d   : > { %v2437_v0 = vld [vmem:[%s2434_s27 + $0x18] sm:$0xff]  ;;  %v2440_v1 = vld [vmem:[%s2434_s27 + $0x20] sm:$0xff]  ;;  %v2448_v5 = vld [vmem:[%s2434_s27 + $0x8] sm:$0xff]  ;;  %s2273_s18 = sshll.u32 %s2357_s16, 4  ;;  %s2274_s18 = int_to_ptr.vmem [resolvable:$false] %s2273_s18 }
  0x1e   : > { %v2443_v2 = vld [vmem:[%s2434_s27] sm:$0xff]  ;;  %v327_v3 = vrot.slane %v2437_v0, 1  ;;  %v328_v4 = vrot.slane %v2440_v1, 1  ;;  %v2452_v7 = vld [vmem:[%s2434_s27 + $0x28] sm:$0x3]  ;;  %243 = vst.msk [vmem:[#allocation2 + $0x10] sm:$0xff] %vm240_vm0, %v2437_v0 }
  0x1f   : > { %v322_v6 = vrot.slane %v2443_v2, 1  ;;  %241 = vst.msk [vmem:[#allocation2] sm:$0xff] %vm240_vm0, %v2443_v2  ;;  %244 = vst.msk [vmem:[#allocation2 + $0x18] sm:$0xff] %vm240_vm0, %v2440_v1  ;;  %v323_v8 = vrot.slane %v2448_v5, 1  ;;  %v330_v9 = vrot.slane %v2452_v7, 1  ;;  %v2466_v11 = vld [vmem:[%s2434_s27 + $0x38] sm:$0xff] }
  0x20   : > { %v2463_v10 = vld [vmem:[%s2434_s27 + $0x10] sm:$0x3]  ;;  %242 = vst.msk [vmem:[#allocation2 + $0x8] sm:$0xff] %vm240_vm0, %v2448_v5  ;;  %v2474_v13 = vsel %vm321_vm1, %v327_v3, %v328_v4  ;;  %v2478_v15 = vld [vmem:[%s2434_s27 + $0x40] sm:$0x3]  ;;  %246 = vst.msk [vmem:[#allocation2 + $0x28] sm:$0xff] %vm240_vm0, %v2466_v11 }
  0x21   : > { %v2469_v12 = vld [vmem:[%s2434_s27 + $0x30] sm:$0xff]  ;;  %v325_v14 = vrot.slane %v2463_v10, 1  ;;  %406 = vrot.lane.b32.xlu1 %v2474_v13, %s2349_s28  ;;  %v324_v17 = vsel %vm321_vm1, %v322_v6, %v323_v8  ;;  %v2491_v18 = vld [vmem:[%s2434_s27 + $0x48] sm:$0xff]  ;;  %v2500_v20 = vsel %vm321_vm1, %v328_v4, %v330_v9  ;;  %v333_v21 = vrot.slane %v2466_v11, 1  ;;  %v2505_v23 = vld [vmem:[%s2434_s27 + $0x60] sm:$0xff]  ;;  %s2275_s20 = scalar_lea.vmem %s2274_s18, 8192 }
  0x22   : > { %v2481_v16 = vld [vmem:[%s2434_s27 + $0x50] sm:$0xff]  ;;  %245 = vst.msk [vmem:[#allocation2 + $0x20] sm:$0xff] %vm240_vm0, %v2469_v12  ;;  %v2494_v19 = vld [vmem:[%s2434_s27 + $0x68] sm:$0xff]  ;;  %402 = vrot.lane.b32.xlu0 %v324_v17, %s2349_s28  ;;  %v335_v22 = vrot.slane %v2478_v15, 1  ;;  %v2508_v24 = vld [vmem:[%s2434_s27 + $0x80] sm:$0xff]  ;;  %v332_v26 = vrot.slane %v2469_v12, 1 }
  0x23   : > { %248 = vst.msk [vmem:[#allocation2 + $0x38] sm:$0xff] %vm240_vm0, %v2481_v16  ;;  %247 = vst.msk [vmem:[#allocation2 + $0x30] sm:$0xff] %vm240_vm0, %v2491_v18  ;;  %v326_v25 = vsel %vm321_vm1, %v323_v8, %v325_v14  ;;  %v2517_v27 = vld [vmem:[%s2434_s27 + $0x58] sm:$0x3]  ;;  %v2530_v30 = vld [vmem:[%s2434_s27 + $0x90] sm:$0xff]  ;;  %v338_v34 = vrot.slane %v2481_v16, 1 }
  0x24   : > { %250 = vst.msk [vmem:[#allocation2 + $0x48] sm:$0xff] %vm240_vm0, %v2494_v19  ;;  %v2520_v28 = vld [vmem:[%s2434_s27 + $0x78] sm:$0xff]  ;;  %249 = vst.msk [vmem:[#allocation2 + $0x40] sm:$0xff] %vm240_vm0, %v2505_v23  ;;  %v2537_v31 = vld [vmem:[%s2434_s27 + $0xb0] sm:$0xff]  ;;  %v2548_v33 = vsel %vm321_vm1, %v333_v21, %v335_v22  ;;  %v340_v35 = vrot.slane %v2517_v27, 1  ;;  %v2563_v38 = vsel %vm321_vm1, %v332_v26, %v333_v21  ;;  %v337_v39 = vrot.slane %v2491_v18, 1 }
  0x25   : > { %252 = vst.msk [vmem:[#allocation2 + $0x58] sm:$0xff] %vm240_vm0, %v2508_v24  ;;  %v2527_v29 = vld [vmem:[%s2434_s27 + $0x98] sm:$0xff]  ;;  %251 = vst.msk [vmem:[#allocation2 + $0x50] sm:$0xff] %vm240_vm0, %v2520_v28  ;;  %408 = vrot.lane.b32.xlu1 %v2500_v20, %s2349_s28  ;;  %v2540_v32 = vld [vmem:[%s2434_s27 + $0xa8] sm:$0xff]  ;;  %v343_v48 = vrot.slane %v2494_v19, 1  ;;  %v342_v53 = vrot.slane %v2505_v23, 1 }
  0x26   : > { %253 = vst.msk [vmem:[#allocation2 + $0x60] sm:$0xff] %vm240_vm0, %v2530_v30  ;;  %254 = vst.msk [vmem:[#allocation2 + $0x68] sm:$0xff] %vm240_vm0, %v2527_v29  ;;  %404 = vrot.lane.b32.xlu0 %v326_v25, %s2349_s28  ;;  %v2553_v36 = vld [vmem:[%s2434_s27 + $0x70] sm:$0x3]  ;;  %v2556_v37 = vld [vmem:[%s2434_s27 + $0xc8] sm:$0xff]  ;;  %v2604_v47 = vsel %vm321_vm1, %v338_v34, %v340_v35  ;;  %v2619_v52 = vsel %vm321_vm1, %v337_v39, %v338_v34  ;;  %v348_v60 = vrot.slane %v2508_v24, 1 }
  0x27   : > { %255 = vst.msk [vmem:[#allocation2 + $0x70] sm:$0xff] %vm240_vm0, %v2540_v32  ;;  %256 = vst.msk [vmem:[#allocation2 + $0x78] sm:$0xff] %vm240_vm0, %v2537_v31  ;;  %v2567_v40 = vld [vmem:[%s2434_s27 + $0xc0] sm:$0xff]  ;;  %v2573_v42 = vld [vmem:[%s2434_s27 + $0xd8] sm:$0xff]  ;;  %v345_v49 = vrot.slane %v2553_v36, 1  ;;  %v2665_v3 = vsel %vm321_vm1, %v342_v53, %v343_v48  ;;  %v347_v4 = vrot.slane %v2520_v28, 1 }
  0x28   : > { %v2570_v41 = vld [vmem:[%s2434_s27 + $0xe0] sm:$0xff]  ;;  %258 = vst.msk [vmem:[#allocation2 + $0x88] sm:$0xff] %vm240_vm0, %v2556_v37  ;;  %v2578_v43 = vld [vmem:[%s2434_s27 + $0xf8] sm:$0xff]  ;;  %v2581_v44 = vld [vmem:[%s2434_s27 + $0xf0] sm:$0xff]  ;;  %v353_v9 = vrot.slane %v2527_v29, 1  ;;  %v352_v21 = vrot.slane %v2530_v30, 1 }
  0x29   : > { %257 = vst.msk [vmem:[#allocation2 + $0x80] sm:$0xff] %vm240_vm0, %v2567_v40  ;;  %259 = vst.msk [vmem:[#allocation2 + $0x90] sm:$0xff] %vm240_vm0, %v2573_v42  ;;  %412 = vrot.lane.b32.xlu1 %v2548_v33, %s2349_s28  ;;  %v2592_v45 = vld [vmem:[%s2434_s27 + $0x110] sm:$0xff]  ;;  %v2595_v46 = vld [vmem:[%s2434_s27 + $0x108] sm:$0xff]  ;;  %v2650_v59 = vsel %vm321_vm1, %v343_v48, %v345_v49  ;;  %v2685_v17 = vsel %vm321_vm1, %v347_v4, %v348_v60  ;;  %v358_v26 = vrot.slane %v2537_v31, 1  ;;  %v357_v39 = vrot.slane %v2540_v32, 1 }
  0x2a   : > { %260 = vst.msk [vmem:[#allocation2 + $0x98] sm:$0xff] %vm240_vm0, %v2570_v41  ;;  %261 = vst.msk [vmem:[#allocation2 + $0xa0] sm:$0xff] %vm240_vm0, %v2581_v44  ;;  %410 = vrot.lane.b32.xlu0 %v2563_v38, %s2349_s28  ;;  %v2609_v50 = vld [vmem:[%s2434_s27 + $0x128] sm:$0xff]  ;;  %v2612_v51 = vld [vmem:[%s2434_s27 + $0x120] sm:$0xff]  ;;  %v2701_v35 = vsel %vm321_vm1, %v352_v21, %v353_v9  ;;  %v363_v53 = vrot.slane %v2556_v37, 1  ;;  %v362_v4 = vrot.slane %v2567_v40, 1 }
  0x2b   : > { %262 = vst.msk [vmem:[#allocation2 + $0xa8] sm:$0xff] %vm240_vm0, %v2578_v43  ;;  %3909 = vst [vmem:[#allocation6_spill] sm:$0xff] %v2604_v47  ;;  %v2623_v54 = vld [vmem:[%s2434_s27 + $0x88] sm:$0x3]  ;;  %v2626_v55 = vld [vmem:[%s2434_s27 + $0x140] sm:$0xff]  ;;  %v368_v21 = vrot.slane %v2570_v41, 1 }
  0x2c   : > { %263 = vst.msk [vmem:[#allocation2 + $0xb0] sm:$0xff] %vm240_vm0, %v2595_v46  ;;  %264 = vst.msk [vmem:[#allocation2 + $0xb8] sm:$0xff] %vm240_vm0, %v2592_v45  ;;  %v2633_v56 = vld [vmem:[%s2434_s27 + $0x138] sm:$0xff]  ;;  %v2643_v58 = vld [vmem:[%s2434_s27 + $0x150] sm:$0xff]  ;;  %v350_v61 = vrot.slane %v2623_v54, 1 }
  0x2d   : > { %3910 = vst [vmem:[#allocation7_spill] sm:$0xff] %v2619_v52  ;;  %265 = vst.msk [vmem:[#allocation2 + $0xc0] sm:$0xff] %vm240_vm0, %v2612_v51  ;;  %416 = vrot.lane.b32.xlu1 %v2604_v47, %s2349_s28  ;;  %v2640_v57 = vld [vmem:[%s2434_s27 + $0x158] sm:$0xff]  ;;  %v2655_v62 = vld [vmem:[%s2434_s27 + $0x170] sm:$0xff]  ;;  %v388_v47 = vrot.slane %v2626_v55, 1 }
  0x2e   : > { %266 = vst.msk [vmem:[#allocation2 + $0xc8] sm:$0xff] %vm240_vm0, %v2609_v50  ;;  %268 = vst.msk [vmem:[#allocation2 + $0xd8] sm:$0xff] %vm240_vm0, %v2626_v55  ;;  %414 = vrot.lane.b32.xlu0 %v2619_v52, %s2349_s28  ;;  %v2658_v63 = vld [vmem:[%s2434_s27 + $0x168] sm:$0xff]  ;;  %v2669_v6 = vld [vmem:[%s2434_s27 + $0xa0] sm:$0x3]  ;;  %v2680_v8 = vsel %vm321_vm1, %v348_v60, %v350_v61  ;;  %v2717_v61 = vsel %vm321_vm1, %v357_v39, %v358_v26  ;;  %v367_v39 = vrot.slane %v2573_v42, 1 }
  0x2f   : > { %267 = vst.msk [vmem:[#allocation2 + $0xd0] sm:$0xff] %vm240_vm0, %v2633_v56  ;;  %3911 = vst [vmem:[#allocation8_spill] sm:$0xff] %v2650_v59  ;;  %v355_v14 = vrot.slane %v2669_v6, 1  ;;  %v2689_v22 = vld [vmem:[%s2434_s27 + $0xb8] sm:$0x3] }
  0x30   : > { %269 = vst.msk [vmem:[#allocation2 + $0xe0] sm:$0xff] %vm240_vm0, %v2643_v58  ;;  %270 = vst.msk [vmem:[#allocation2 + $0xe8] sm:$0xff] %vm240_vm0, %v2640_v57  ;;  %v360_v34 = vrot.slane %v2689_v22, 1  ;;  %v2705_v48 = vld [vmem:[%s2434_s27 + $0xd0] sm:$0x3] }
  0x31   : > { %3912 = vst [vmem:[#allocation9_spill] sm:$0xff] %v2665_v3  ;;  %271 = vst.msk [vmem:[#allocation2 + $0xf0] sm:$0xff] %vm240_vm0, %v2658_v63  ;;  %420 = vrot.lane.b32.xlu1 %v2650_v59, %s2349_s28  ;;  %v2696_v25 = vsel %vm321_vm1, %v353_v9, %v355_v14  ;;  %v365_v60 = vrot.slane %v2705_v48, 1  ;;  %v2721_v9 = vld [vmem:[%s2434_s27 + $0xe8] sm:$0x3] }
  0x32   : > { %272 = vst.msk [vmem:[#allocation2 + $0xf8] sm:$0xff] %vm240_vm0, %v2655_v62  ;;  %418 = vrot.lane.b32.xlu0 %v2665_v3, %s2349_s28  ;;  %3913 = vst [vmem:[#allocation10_spill] sm:$0xff] %v2680_v8  ;;  %v2712_v49 = vsel %vm321_vm1, %v358_v26, %v360_v34  ;;  %v370_v34 = vrot.slane %v2721_v9, 1  ;;  %v2733_v26 = vsel %vm321_vm1, %v362_v4, %v363_v53  ;;  %v372_v4 = vrot.slane %v2581_v44, 1  ;;  %v2785_v3 = vld [vmem:[%s2434_s27 + $0x148] sm:$0x3] }
  0x33   : > { %3914 = vst [vmem:[#allocation11_spill] sm:$0xff] %v2685_v17  ;;  %3915 = vst [vmem:[#allocation12_spill] sm:$0xff] %v2696_v25  ;;  %v2728_v14 = vsel %vm321_vm1, %v363_v53, %v365_v60  ;;  %v2749_v53 = vsel %vm321_vm1, %v367_v39, %v368_v21  ;;  %v377_v39 = vrot.slane %v2595_v46, 1  ;;  %v390_v52 = vrot.slane %v2785_v3, 1 }
  0x34   : > { %3916 = vst [vmem:[#allocation13_spill] sm:$0xff] %v2701_v35  ;;  %3917 = vst [vmem:[#allocation14_spill] sm:$0xff] %v2712_v49  ;;  %v2744_v60 = vsel %vm321_vm1, %v368_v21, %v370_v34 }
  0x35   : > { %424 = vrot.lane.b32.xlu1 %v2680_v8, %s2349_s28  ;;  %3918 = vst [vmem:[#allocation15_spill] sm:$0xff] %v2717_v61  ;;  %3919 = vst [vmem:[#allocation16_spill] sm:$0xff] %v2728_v14  ;;  %v2769_v8 = vld [vmem:[%s2434_s27 + $0x130] sm:$0x3] }
  0x36   : > { %422 = vrot.lane.b32.xlu0 %v2685_v17, %s2349_s28  ;;  %3920 = vst [vmem:[#allocation17_spill] sm:$0xff] %v2733_v26  ;;  %3921 = vst [vmem:[#allocation18_spill] sm:$0xff] %v2749_v53  ;;  %v383_v17 = vrot.slane %v2609_v50, 1  ;;  %v385_v59 = vrot.slane %v2769_v8, 1 }
  0x39   : > { %428 = vrot.lane.b32.xlu1 %v2696_v25, %s2349_s28  ;;  %v2737_v25 = vld [vmem:[%s2434_s27 + $0x100] sm:$0x3] }
  0x3a   : > { %426 = vrot.lane.b32.xlu0 %v2701_v35, %s2349_s28  ;;  %v2753_v35 = vld [vmem:[%s2434_s27 + $0x118] sm:$0x3] }
  0x3d   : > { %432 = vrot.lane.b32.xlu1 %v2712_v49, %s2349_s28  ;;  %v373_v49 = vrot.slane %v2578_v43, 1 }
  0x3e   : > { %430 = vrot.lane.b32.xlu0 %v2717_v61, %s2349_s28  ;;  %v375_v61 = vrot.slane %v2737_v25, 1 }
  0x3f   : > { %v2765_v21 = vsel %vm321_vm1, %v372_v4, %v373_v49  ;;  %v382_v4 = vrot.slane %v2612_v51, 1 }
  0x40   : > { %v2760_v34 = vsel %vm321_vm1, %v373_v49, %v375_v61  ;;  %3923 = vst [vmem:[#allocation20_spill] sm:$0xff] %v2765_v21 }
  0x41   : > { %436 = vrot.lane.b32.xlu1 %v2728_v14, %s2349_s28  ;;  %3922 = vst [vmem:[#allocation19_spill] sm:$0xff] %v2760_v34  ;;  %v378_v14 = vrot.slane %v2592_v45, 1 }
  0x42   : > { %434 = vrot.lane.b32.xlu0 %v2733_v26, %s2349_s28  ;;  %v380_v26 = vrot.slane %v2753_v35, 1 }
  0x43   : > { %v2781_v49 = vsel %vm321_vm1, %v377_v39, %v378_v14  ;;  %v387_v39 = vrot.slane %v2633_v56, 1 }
  0x44   : > { %v2776_v61 = vsel %vm321_vm1, %v378_v14, %v380_v26  ;;  %3925 = vst [vmem:[#allocation22_spill] sm:$0xff] %v2781_v49  ;;  %v2792_v26 = vsel %vm321_vm1, %v383_v17, %v385_v59  ;;  %v2797_v14 = vsel %vm321_vm1, %v382_v4, %v383_v17  ;;  %v2808_v59 = vsel %vm321_vm1, %v388_v47, %v390_v52 }
  0x45   : > { %440 = vrot.lane.b32.xlu1 %v2744_v60, %s2349_s28  ;;  %3924 = vst [vmem:[#allocation21_spill] sm:$0xff] %v2776_v61  ;;  %3926 = vst [vmem:[#allocation23_spill] sm:$0xff] %v2792_v26  ;;  %v2813_v17 = vsel %vm321_vm1, %v387_v39, %v388_v47  ;;  %v392_v4 = vrot.slane %v2643_v58, 1  ;;  %v397_v39 = vrot.slane %v2658_v63, 1 }
  0x46   : > { %438 = vrot.lane.b32.xlu0 %v2749_v53, %s2349_s28  ;;  %3927 = vst [vmem:[#allocation24_spill] sm:$0xff] %v2797_v14  ;;  %3928 = vst [vmem:[#allocation25_spill] sm:$0xff] %v2808_v59 }
  0x47   : > { %3929 = vst [vmem:[#allocation26_spill] sm:$0xff] %v2813_v17 }
  0x49   : > { %444 = vrot.lane.b32.xlu1 %v2760_v34, %s2349_s28  ;;  %v2801_v34 = vld [vmem:[%s2434_s27 + $0x160] sm:$0x3] }
  0x4a   : > { %442 = vrot.lane.b32.xlu0 %v2765_v21, %s2349_s28  ;;  %v2817_v21 = vld [vmem:[%s2434_s27 + $0x178] sm:$0x3] }
  0x4d   : > { %448 = vrot.lane.b32.xlu1 %v2776_v61, %s2349_s28  ;;  %v393_v61 = vrot.slane %v2640_v57, 1 }
  0x4e   : > { %446 = vrot.lane.b32.xlu0 %v2781_v49, %s2349_s28  ;;  %v395_v49 = vrot.slane %v2801_v34, 1 }
  0x4f   : > { %v2829_v47 = vsel %vm321_vm1, %v392_v4, %v393_v61 }
  0x50   : > { %v2824_v52 = vsel %vm321_vm1, %v393_v61, %v395_v49  ;;  %3931 = vst [vmem:[#allocation28_spill] sm:$0xff] %v2829_v47  ;;  %v533_v49 = vrot.slane %v2448_v5, 2  ;;  %v532_v61 = vrot.slane %v2443_v2, 2  ;;  %v540_v5 = vrot.slane %v2452_v7, 2 }
  0x51   : > { %452 = vrot.lane.b32.xlu1 %v2792_v26, %s2349_s28  ;;  %3930 = vst [vmem:[#allocation27_spill] sm:$0xff] %v2824_v52  ;;  %v398_v26 = vrot.slane %v2655_v62, 1  ;;  %v542_v7 = vrot.slane %v2469_v12, 2 }
  0x52   : > { %450 = vrot.lane.b32.xlu0 %v2797_v14, %s2349_s28  ;;  %v400_v14 = vrot.slane %v2817_v21, 1 }
  0x53   : > { %v2842_v53 = vsel %vm321_vm1, %v397_v39, %v398_v26  ;;  %v543_v39 = vrot.slane %v2466_v11, 2 }
  0x54   : > { %3933 = vst [vmem:[#allocation30_spill] sm:$0xff] %v2842_v53 }
  0x55   : > { %456 = vrot.lane.b32.xlu1 %v2808_v59, %s2349_s28  ;;  %v2837_v59 = vsel %vm321_vm1, %v398_v26, %v400_v14  ;;  %v538_v14 = vrot.slane %v2440_v1, 2  ;;  %v537_v26 = vrot.slane %v2437_v0, 2 }
  0x56   : > { %454 = vrot.lane.b32.xlu0 %v2813_v17, %s2349_s28  ;;  %3932 = vst [vmem:[#allocation29_spill] sm:$0xff] %v2837_v59  ;;  %v535_v17 = vrot.slane %v2463_v10, 2  ;;  %v534_v10 = vsel %vm531_vm2, %v532_v61, %v533_v49  ;;  %v548_v61 = vrot.slane %v2481_v16, 2 }
  0x57   : > { %v2857_v2 = vsel %vm531_vm2, %v538_v14, %v540_v5 }
  0x58   : > { %v536_v4 = vsel %vm531_vm2, %v533_v49, %v535_v17  ;;  %v545_v17 = vrot.slane %v2478_v15, 2  ;;  %v2875_v15 = vsel %vm531_vm2, %v542_v7, %v543_v39  ;;  %v558_v7 = vrot.slane %v2508_v24, 2 }
  0x59   : > { %460 = vrot.lane.b32.xlu1 %v2824_v52, %s2349_s28  ;;  %v570_v52 = vrot.slane %v2689_v22, 2 }
  0x5a   : > { %458 = vrot.lane.b32.xlu0 %v2829_v47, %s2349_s28  ;;  %v2870_v49 = vsel %vm531_vm2, %v543_v39, %v545_v17  ;;  %v552_v39 = vrot.slane %v2505_v23, 2  ;;  %v575_v47 = vrot.slane %v2705_v48, 2 }
  0x5d   : > { %464 = vrot.lane.b32.xlu1 %v2837_v59, %s2349_s28  ;;  %v2862_v59 = vsel %vm531_vm2, %v537_v26, %v538_v14  ;;  %v547_v14 = vrot.slane %v2491_v18, 2  ;;  %v555_v26 = vrot.slane %v2553_v36, 2 }
  0x5e   : > { %462 = vrot.lane.b32.xlu0 %v2842_v53, %s2349_s28  ;;  %v565_v53 = vrot.slane %v2669_v6, 2 }
  0x61   : > { %614 = vrot.lane.b32.xlu1 %v536_v4, %s2350_s29  ;;  %v550_v4 = vrot.slane %v2517_v27, 2  ;;  %v2888_v27 = vsel %vm531_vm2, %v547_v14, %v548_v61 }
  0x62   : > { %612 = vrot.lane.b32.xlu0 %v534_v10, %s2350_s29  ;;  %v553_v10 = vrot.slane %v2494_v19, 2 }
  0x63   : > { %v2883_v5 = vsel %vm531_vm2, %v548_v61, %v550_v4  ;;  %v560_v4 = vrot.slane %v2623_v54, 2  ;;  %v557_v61 = vrot.slane %v2520_v28, 2 }
  0x64   : > { %v2896_v17 = vsel %vm531_vm2, %v553_v10, %v555_v26  ;;  %v2901_v36 = vsel %vm531_vm2, %v552_v39, %v553_v10  ;;  %v563_v26 = vrot.slane %v2527_v29, 2  ;;  %v562_v10 = vrot.slane %v2530_v30, 2 }
  0x65   : > { %618 = vrot.lane.b32.xlu1 %v2857_v2, %s2350_s29  ;;  %v2909_v14 = vsel %vm531_vm2, %v558_v7, %v560_v4  ;;  %v2914_v54 = vsel %vm531_vm2, %v557_v61, %v558_v7  ;;  %v568_v4 = vrot.slane %v2537_v31, 2  ;;  %v567_v7 = vrot.slane %v2540_v32, 2 }
  0x66   : > { %616 = vrot.lane.b32.xlu0 %v2862_v59, %s2350_s29  ;;  %3934 = vst [vmem:[#allocation31_spill] sm:$0xff] %v2909_v14  ;;  %3935 = vst [vmem:[#allocation32_spill] sm:$0xff] %v2914_v54  ;;  %v2922_v39 = vsel %vm531_vm2, %v563_v26, %v565_v53  ;;  %v2927_v6 = vsel %vm531_vm2, %v562_v10, %v563_v26  ;;  %v573_v53 = vrot.slane %v2556_v37, 2  ;;  %v572_v26 = vrot.slane %v2567_v40, 2 }
  0x67   : > { %3936 = vst [vmem:[#allocation33_spill] sm:$0xff] %v2922_v39  ;;  %3937 = vst [vmem:[#allocation34_spill] sm:$0xff] %v2927_v6  ;;  %v2935_v61 = vsel %vm531_vm2, %v568_v4, %v570_v52  ;;  %v2940_v22 = vsel %vm531_vm2, %v567_v7, %v568_v4  ;;  %v578_v52 = vrot.slane %v2570_v41, 2  ;;  %v577_v4 = vrot.slane %v2573_v42, 2 }
  0x68   : > { %3938 = vst [vmem:[#allocation35_spill] sm:$0xff] %v2935_v61  ;;  %3939 = vst [vmem:[#allocation36_spill] sm:$0xff] %v2940_v22  ;;  %v2948_v10 = vsel %vm531_vm2, %v573_v53, %v575_v47  ;;  %v2953_v48 = vsel %vm531_vm2, %v572_v26, %v573_v53  ;;  %v583_v47 = vrot.slane %v2578_v43, 2  ;;  %v582_v53 = vrot.slane %v2581_v44, 2 }
  0x69   : > { %622 = vrot.lane.b32.xlu1 %v2870_v49, %s2350_s29  ;;  %3940 = vst [vmem:[#allocation37_spill] sm:$0xff] %v2948_v10  ;;  %3941 = vst [vmem:[#allocation38_spill] sm:$0xff] %v2953_v48 }
  0x6a   : > { %620 = vrot.lane.b32.xlu0 %v2875_v15, %s2350_s29 }
  0x6d   : > { %626 = vrot.lane.b32.xlu1 %v2883_v5, %s2350_s29 }
  0x6e   : > { %624 = vrot.lane.b32.xlu0 %v2888_v27, %s2350_s29 }
  0x71   : > { %630 = vrot.lane.b32.xlu1 %v2896_v17, %s2350_s29 }
  0x72   : > { %628 = vrot.lane.b32.xlu0 %v2901_v36, %s2350_s29 }
  0x75   : > { %634 = vrot.lane.b32.xlu1 %v2909_v14, %s2350_s29 }
  0x76   : > { %632 = vrot.lane.b32.xlu0 %v2914_v54, %s2350_s29 }
  0x79   : > { %638 = vrot.lane.b32.xlu1 %v2922_v39, %s2350_s29  ;;  %v580_v39 = vrot.slane %v2721_v9, 2  ;;  %v2966_v9 = vsel %vm531_vm2, %v577_v4, %v578_v52 }
  0x7a   : > { %636 = vrot.lane.b32.xlu0 %v2927_v6, %s2350_s29  ;;  %v605_v6 = vrot.slane %v2801_v34, 2  ;;  %v608_v34 = vrot.slane %v2655_v62, 2 }
  0x7b   : > { %v2961_v7 = vsel %vm531_vm2, %v578_v52, %v580_v39  ;;  %v588_v39 = vrot.slane %v2592_v45, 2  ;;  %v587_v52 = vrot.slane %v2595_v46, 2 }
  0x7d   : > { %642 = vrot.lane.b32.xlu1 %v2935_v61, %s2350_s29  ;;  %v585_v61 = vrot.slane %v2737_v25, 2  ;;  %v2979_v25 = vsel %vm531_vm2, %v582_v53, %v583_v47 }
  0x7e   : > { %640 = vrot.lane.b32.xlu0 %v2940_v22, %s2350_s29  ;;  %v600_v22 = vrot.slane %v2785_v3, 2 }
  0x7f   : > { %v2974_v26 = vsel %vm531_vm2, %v583_v47, %v585_v61  ;;  %v593_v61 = vrot.slane %v2609_v50, 2  ;;  %v592_v47 = vrot.slane %v2612_v51, 2 }
  0x81   : > { %646 = vrot.lane.b32.xlu1 %v2948_v10, %s2350_s29  ;;  %v590_v10 = vrot.slane %v2753_v35, 2  ;;  %v2992_v35 = vsel %vm531_vm2, %v587_v52, %v588_v39 }
  0x82   : > { %644 = vrot.lane.b32.xlu0 %v2953_v48, %s2350_s29  ;;  %v595_v48 = vrot.slane %v2769_v8, 2  ;;  %v3005_v8 = vsel %vm531_vm2, %v592_v47, %v593_v61  ;;  %v602_v47 = vrot.slane %v2643_v58, 2 }
  0x83   : > { %v2987_v4 = vsel %vm531_vm2, %v588_v39, %v590_v10  ;;  %v598_v10 = vrot.slane %v2626_v55, 2  ;;  %v597_v39 = vrot.slane %v2633_v56, 2 }
  0x84   : > { %v3000_v53 = vsel %vm531_vm2, %v593_v61, %v595_v48  ;;  %v603_v48 = vrot.slane %v2640_v57, 2 }
  0x85   : > { %650 = vrot.lane.b32.xlu1 %v2961_v7, %s2350_s29  ;;  %v3013_v52 = vsel %vm531_vm2, %v598_v10, %v600_v22  ;;  %v3018_v61 = vsel %vm531_vm2, %v597_v39, %v598_v10  ;;  %v610_v10 = vrot.slane %v2817_v21, 2 }
  0x86   : > { %648 = vrot.lane.b32.xlu0 %v2966_v9, %s2350_s29  ;;  %v3028_v22 = vsel %vm531_vm2, %v603_v48, %v605_v6  ;;  %v3033_v54 = vsel %vm531_vm2, %v602_v47, %v603_v48 }
  0x87   : > { %v3043_v6 = vsel %vm531_vm2, %v608_v34, %v610_v10 }
  0x89   : > { %654 = vrot.lane.b32.xlu1 %v2974_v26, %s2350_s29 }
  0x8a   : > { %652 = vrot.lane.b32.xlu0 %v2979_v25, %s2350_s29 }
  0x8d   : > { %658 = vrot.lane.b32.xlu1 %v2987_v4, %s2350_s29 }
  0x8e   : > { %656 = vrot.lane.b32.xlu0 %v2992_v35, %s2350_s29 }
  0x91   : > { %662 = vrot.lane.b32.xlu1 %v3000_v53, %s2350_s29 }
  0x92   : > { %660 = vrot.lane.b32.xlu0 %v3005_v8, %s2350_s29 }
  0x93   : > { %v407_v3 = vpop.permute.xlu1 %406 }
  0x94   : > { %501 = vst.msk [vmem:[#allocation2 + $0x10] sm:$0xff] %vm498_vm3, %v407_v3  ;;  %v403_v14 = vpop.permute.xlu0 %402  ;;  %v607_v3 = vrot.slane %v2658_v63, 2 }
  0x95   : > { %499 = vst.msk [vmem:[#allocation2] sm:$0xff] %vm498_vm3, %v403_v14  ;;  %666 = vrot.lane.b32.xlu1 %v3013_v52, %s2350_s29 }
  0x96   : > { %664 = vrot.lane.b32.xlu0 %v3018_v61, %s2350_s29  ;;  %v3046_v48 = vsel %vm531_vm2, %v607_v3, %v608_v34 }
  0x97   : > { %v409_v39 = vpop.permute.xlu1 %408 }
  0x98   : > { %502 = vst.msk [vmem:[#allocation2 + $0x18] sm:$0xff] %vm498_vm3, %v409_v39  ;;  %v405_v14 = vpop.permute.xlu0 %404 }
  0x99   : > { %500 = vst.msk [vmem:[#allocation2 + $0x8] sm:$0xff] %vm498_vm3, %v405_v14  ;;  %670 = vrot.lane.b32.xlu1 %v3028_v22, %s2350_s29 }
  0x9a   : > { %668 = vrot.lane.b32.xlu0 %v3033_v54, %s2350_s29 }
  0x9b   : > { %v413_v21 = vpop.permute.xlu1 %412 }
  0x9c   : > { %504 = vst.msk [vmem:[#allocation2 + $0x28] sm:$0xff] %vm498_vm3, %v413_v21  ;;  %v411_v47 = vpop.permute.xlu0 %410 }
  0x9d   : > { %503 = vst.msk [vmem:[#allocation2 + $0x20] sm:$0xff] %vm498_vm3, %v411_v47  ;;  %674 = vrot.lane.b32.xlu1 %v3043_v6, %s2350_s29 }
  0x9e   : > { %672 = vrot.lane.b32.xlu0 %v3046_v48, %s2350_s29 }
  0x9f   : > { %v417_v39 = vpop.permute.xlu1 %416 }
  0xa0   : > { %506 = vst.msk [vmem:[#allocation2 + $0x38] sm:$0xff] %vm498_vm3, %v417_v39  ;;  %v415_v10 = vpop.permute.xlu0 %414 }
  0xa1   : > { %505 = vst.msk [vmem:[#allocation2 + $0x30] sm:$0xff] %vm498_vm3, %v415_v10  ;;  %745 = vrot.lane.b32.xlu1 %v2440_v1, %s2351_s30 }
  0xa2   : > { %743 = vrot.lane.b32.xlu0 %v2437_v0, %s2351_s30 }
  0xa3   : > { %v421_v34 = vpop.permute.xlu1 %420 }
  0xa4   : > { %508 = vst.msk [vmem:[#allocation2 + $0x48] sm:$0xff] %vm498_vm3, %v421_v34  ;;  %v419_v3 = vpop.permute.xlu0 %418 }
  0xa5   : > { %507 = vst.msk [vmem:[#allocation2 + $0x40] sm:$0xff] %vm498_vm3, %v419_v3  ;;  %749 = vrot.lane.b32.xlu1 %v2466_v11, %s2351_s30 }
  0xa6   : > { %747 = vrot.lane.b32.xlu0 %v2469_v12, %s2351_s30 }
  0xa7   : > { %v425_v14 = vpop.permute.xlu1 %424 }
  0xa8   : > { %510 = vst.msk [vmem:[#allocation2 + $0x58] sm:$0xff] %vm498_vm3, %v425_v14  ;;  %v423_v21 = vpop.permute.xlu0 %422 }
  0xa9   : > { %509 = vst.msk [vmem:[#allocation2 + $0x50] sm:$0xff] %vm498_vm3, %v423_v21  ;;  %753 = vrot.lane.b32.xlu1 %v2481_v16, %s2351_s30 }
  0xaa   : > { %751 = vrot.lane.b32.xlu0 %v2491_v18, %s2351_s30 }
  0xab   : > { %v429_v0 = vpop.permute.xlu1 %428 }
  0xac   : > { %512 = vst.msk [vmem:[#allocation2 + $0x68] sm:$0xff] %vm498_vm3, %v429_v0  ;;  %v427_v1 = vpop.permute.xlu0 %426 }
  0xad   : > { %511 = vst.msk [vmem:[#allocation2 + $0x60] sm:$0xff] %vm498_vm3, %v427_v1  ;;  %757 = vrot.lane.b32.xlu1 %v2494_v19, %s2351_s30 }
  0xae   : > { %755 = vrot.lane.b32.xlu0 %v2505_v23, %s2351_s30 }
  0xaf   : > { %v433_v47 = vpop.permute.xlu1 %432 }
  0xb0   : > { %514 = vst.msk [vmem:[#allocation2 + $0x78] sm:$0xff] %vm498_vm3, %v433_v47  ;;  %v431_v39 = vpop.permute.xlu0 %430 }
  0xb1   : > { %513 = vst.msk [vmem:[#allocation2 + $0x70] sm:$0xff] %vm498_vm3, %v431_v39  ;;  %761 = vrot.lane.b32.xlu1 %v2508_v24, %s2351_s30 }
  0xb2   : > { %759 = vrot.lane.b32.xlu0 %v2520_v28, %s2351_s30 }
  0xb3   : > { %v437_v10 = vpop.permute.xlu1 %436 }
  0xb4   : > { %516 = vst.msk [vmem:[#allocation2 + $0x88] sm:$0xff] %vm498_vm3, %v437_v10  ;;  %v435_v34 = vpop.permute.xlu0 %434 }
  0xb5   : > { %515 = vst.msk [vmem:[#allocation2 + $0x80] sm:$0xff] %vm498_vm3, %v435_v34  ;;  %765 = vrot.lane.b32.xlu1 %v2527_v29, %s2351_s30 }
  0xb6   : > { %763 = vrot.lane.b32.xlu0 %v2530_v30, %s2351_s30 }
  0xb7   : > { %v441_v3 = vpop.permute.xlu1 %440 }
  0xb8   : > { %518 = vst.msk [vmem:[#allocation2 + $0x98] sm:$0xff] %vm498_vm3, %v441_v3  ;;  %v439_v14 = vpop.permute.xlu0 %438 }
  0xb9   : > { %517 = vst.msk [vmem:[#allocation2 + $0x90] sm:$0xff] %vm498_vm3, %v439_v14  ;;  %769 = vrot.lane.b32.xlu1 %v2537_v31, %s2351_s30 }
  0xba   : > { %767 = vrot.lane.b32.xlu0 %v2540_v32, %s2351_s30 }
  0xbb   : > { %v445_v21 = vpop.permute.xlu1 %444 }
  0xbc   : > { %520 = vst.msk [vmem:[#allocation2 + $0xa8] sm:$0xff] %vm498_vm3, %v445_v21  ;;  %v443_v0 = vpop.permute.xlu0 %442 }
  0xbd   : > { %519 = vst.msk [vmem:[#allocation2 + $0xa0] sm:$0xff] %vm498_vm3, %v443_v0  ;;  %773 = vrot.lane.b32.xlu1 %v2556_v37, %s2351_s30 }
  0xbe   : > { %771 = vrot.lane.b32.xlu0 %v2567_v40, %s2351_s30 }
  0xbf   : > { %v449_v1 = vpop.permute.xlu1 %448 }
  0xc0   : > { %522 = vst.msk [vmem:[#allocation2 + $0xb8] sm:$0xff] %vm498_vm3, %v449_v1  ;;  %v447_v47 = vpop.permute.xlu0 %446 }
  0xc1   : > { %521 = vst.msk [vmem:[#allocation2 + $0xb0] sm:$0xff] %vm498_vm3, %v447_v47  ;;  %777 = vrot.lane.b32.xlu1 %v2570_v41, %s2351_s30 }
  0xc2   : > { %775 = vrot.lane.b32.xlu0 %v2573_v42, %s2351_s30 }
  0xc3   : > { %v453_v39 = vpop.permute.xlu1 %452 }
  0xc4   : > { %524 = vst.msk [vmem:[#allocation2 + $0xc8] sm:$0xff] %vm498_vm3, %v453_v39  ;;  %v451_v10 = vpop.permute.xlu0 %450 }
  0xc5   : > { %523 = vst.msk [vmem:[#allocation2 + $0xc0] sm:$0xff] %vm498_vm3, %v451_v10  ;;  %781 = vrot.lane.b32.xlu1 %v2578_v43, %s2351_s30 }
  0xc6   : > { %779 = vrot.lane.b32.xlu0 %v2581_v44, %s2351_s30 }
  0xc7   : > { %v457_v34 = vpop.permute.xlu1 %456 }
  0xc8   : > { %526 = vst.msk [vmem:[#allocation2 + $0xd8] sm:$0xff] %vm498_vm3, %v457_v34  ;;  %v455_v3 = vpop.permute.xlu0 %454 }
  0xc9   : > { %525 = vst.msk [vmem:[#allocation2 + $0xd0] sm:$0xff] %vm498_vm3, %v455_v3  ;;  %785 = vrot.lane.b32.xlu1 %v2592_v45, %s2351_s30  ;;  %v3145_v3 = vld [vmem:[%s2434_s27 + $0x188] sm:$0xff] }
  0xca   : > { %783 = vrot.lane.b32.xlu0 %v2595_v46, %s2351_s30 }
  0xcb   : > { %v461_v14 = vpop.permute.xlu1 %460 }
  0xcc   : > { %528 = vst.msk [vmem:[#allocation2 + $0xe8] sm:$0xff] %vm498_vm3, %v461_v14  ;;  %v459_v21 = vpop.permute.xlu0 %458 }
  0xcd   : > { %527 = vst.msk [vmem:[#allocation2 + $0xe0] sm:$0xff] %vm498_vm3, %v459_v21  ;;  %789 = vrot.lane.b32.xlu1 %v2609_v50, %s2351_s30  ;;  %v3148_v21 = vld [vmem:[%s2434_s27 + $0x180] sm:$0xff] }
  0xce   : > { %787 = vrot.lane.b32.xlu0 %v2612_v51, %s2351_s30 }
  0xcf   : > { %v465_v0 = vpop.permute.xlu1 %464 }
  0xd0   : > { %530 = vst.msk [vmem:[#allocation2 + $0xf8] sm:$0xff] %vm498_vm3, %v465_v0  ;;  %v463_v1 = vpop.permute.xlu0 %462 }
  0xd1   : > { %529 = vst.msk [vmem:[#allocation2 + $0xf0] sm:$0xff] %vm498_vm3, %v463_v1  ;;  %793 = vrot.lane.b32.xlu1 %v2626_v55, %s2351_s30 }
  0xd2   : > { %791 = vrot.lane.b32.xlu0 %v2633_v56, %s2351_s30 }
  0xd3   : > { %v615_v47 = vpop.permute.xlu1 %614 }
  0xd4   : > { %710 = vst.msk [vmem:[#allocation2 + $0x8] sm:$0xff] %vm708_vm4, %v615_v47  ;;  %v613_v39 = vpop.permute.xlu0 %612 }
  0xd5   : > { %709 = vst.msk [vmem:[#allocation2] sm:$0xff] %vm708_vm4, %v613_v39  ;;  %797 = vrot.lane.b32.xlu1 %v2640_v57, %s2351_s30 }
  0xd6   : > { %795 = vrot.lane.b32.xlu0 %v2643_v58, %s2351_s30 }
  0xd7   : > { %v619_v10 = vpop.permute.xlu1 %618 }
  0xd8   : > { %712 = vst.msk [vmem:[#allocation2 + $0x18] sm:$0xff] %vm708_vm4, %v619_v10  ;;  %v617_v34 = vpop.permute.xlu0 %616 }
  0xd9   : > { %711 = vst.msk [vmem:[#allocation2 + $0x10] sm:$0xff] %vm708_vm4, %v617_v34  ;;  %801 = vrot.lane.b32.xlu1 %v2655_v62, %s2351_s30 }
  0xda   : > { %799 = vrot.lane.b32.xlu0 %v2658_v63, %s2351_s30 }
  0xdb   : > { %v623_v14 = vpop.permute.xlu1 %622 }
  0xdc   : > { %714 = vst.msk [vmem:[#allocation2 + $0x28] sm:$0xff] %vm708_vm4, %v623_v14  ;;  %v621_v0 = vpop.permute.xlu0 %620 }
  0xdd   : > { %713 = vst.msk [vmem:[#allocation2 + $0x20] sm:$0xff] %vm708_vm4, %v621_v0  ;;  %805 = vrot.lane.b32.xlu1 %v3145_v3, %s2351_s30 }
  0xde   : > { %803 = vrot.lane.b32.xlu0 %v3148_v21, %s2351_s30 }
  0xdf   : > { %v627_v1 = vpop.permute.xlu1 %626 }
  0xe0   : > { %716 = vst.msk [vmem:[#allocation2 + $0x38] sm:$0xff] %vm708_vm4, %v627_v1  ;;  %v625_v47 = vpop.permute.xlu0 %624 }
  0xe1   : > { %715 = vst.msk [vmem:[#allocation2 + $0x30] sm:$0xff] %vm708_vm4, %v625_v47  ;;  %880 = vrot.lane.b32.xlu1 %v2500_v20, %s2352_s3 }
  0xe2   : > { %878 = vrot.lane.b32.xlu0 %v2474_v13, %s2352_s3  ;;  %v3942_v13 = vld [vmem:[#allocation18_spill] sm:$0xff] }
  0xe3   : > { %v631_v39 = vpop.permute.xlu1 %630 }
  0xe4   : > { %718 = vst.msk [vmem:[#allocation2 + $0x48] sm:$0xff] %vm708_vm4, %v631_v39  ;;  %v629_v10 = vpop.permute.xlu0 %628 }
  0xe5   : > { %717 = vst.msk [vmem:[#allocation2 + $0x40] sm:$0xff] %vm708_vm4, %v629_v10  ;;  %884 = vrot.lane.b32.xlu1 %v2548_v33, %s2352_s3 }
  0xe6   : > { %882 = vrot.lane.b32.xlu0 %v2563_v38, %s2352_s3 }
  0xe7   : > { %v635_v34 = vpop.permute.xlu1 %634 }
  0xe8   : > { %720 = vst.msk [vmem:[#allocation2 + $0x58] sm:$0xff] %vm708_vm4, %v635_v34  ;;  %v633_v14 = vpop.permute.xlu0 %632 }
  0xe9   : > { %719 = vst.msk [vmem:[#allocation2 + $0x50] sm:$0xff] %vm708_vm4, %v633_v14  ;;  %912 = vrot.lane.b32.xlu1 %v2744_v60, %s2352_s3 }
  0xea   : > { %910 = vrot.lane.b32.xlu0 %v3942_v13, %s2352_s3 }
  0xeb   : > { %v639_v20 = vpop.permute.xlu1 %638 }
  0xec   : > { %722 = vst.msk [vmem:[#allocation2 + $0x68] sm:$0xff] %vm708_vm4, %v639_v20  ;;  %v637_v0 = vpop.permute.xlu0 %636  ;;  %v1574_v20 = vld [vmem:[%s3839_s1 + $0x8] sm:$0xff] }
  0xed   : > { %721 = vst.msk [vmem:[#allocation2 + $0x60] sm:$0xff] %vm708_vm4, %v637_v0  ;;  %1044 = vrot.lane.b32.xlu1 %v2966_v9, %s2353_s4 }
  0xee   : > { %1012 = vrot.lane.b32.xlu0 %v2862_v59, %s2353_s4 }
  0xef   : > { %v643_v1 = vpop.permute.xlu1 %642 }
  0xf0   : > { %724 = vst.msk [vmem:[#allocation2 + $0x78] sm:$0xff] %vm708_vm4, %v643_v1  ;;  %v641_v47 = vpop.permute.xlu0 %640 }
  0xf1   : > { %723 = vst.msk [vmem:[#allocation2 + $0x70] sm:$0xff] %vm708_vm4, %v641_v47  ;;  %1046 = vrot.lane.b32.xlu1 %v2961_v7, %s2353_s4  ;;  %v1575_v47 = vld [vmem:[%s3839_s1 + $0x10] sm:$0xff] }
  0xf2   : > { %1014 = vrot.lane.b32.xlu0 %v2857_v2, %s2353_s4 }
  0xf3   : > { %v647_v39 = vpop.permute.xlu1 %646 }
  0xf4   : > { %726 = vst.msk [vmem:[#allocation2 + $0x88] sm:$0xff] %vm708_vm4, %v647_v39  ;;  %v645_v10 = vpop.permute.xlu0 %644 }
  0xf5   : > { %725 = vst.msk [vmem:[#allocation2 + $0x80] sm:$0xff] %vm708_vm4, %v645_v10  ;;  %1175 = vrot.lane.b32.xlu1 %v2581_v44, %s2354_s5  ;;  %v3944_v10 = vld [vmem:[#allocation19_spill] sm:$0xff] }
  0xf6   : > { %1143 = vrot.lane.b32.xlu0 %v2469_v12, %s2354_s5  ;;  %v3943_v12 = vld [vmem:[#allocation20_spill] sm:$0xff] }
  0xf7   : > { %v651_v59 = vpop.permute.xlu1 %650 }
  0xf8   : > { %728 = vst.msk [vmem:[#allocation2 + $0x98] sm:$0xff] %vm708_vm4, %v651_v59  ;;  %v649_v34 = vpop.permute.xlu0 %648 }
  0xf9   : > { %727 = vst.msk [vmem:[#allocation2 + $0x90] sm:$0xff] %vm708_vm4, %v649_v34  ;;  %1177 = vrot.lane.b32.xlu1 %v2578_v43, %s2354_s5 }
  0xfa   : > { %1145 = vrot.lane.b32.xlu0 %v2466_v11, %s2354_s5  ;;  %v1573_v11 = vld [vmem:[%s3839_s1] sm:$0xff] }
  0xfb   : > { %v655_v2 = vpop.permute.xlu1 %654  ;;  %v2190_v0 = vpack.c.bf16 %v1574_v20, %v1573_v11 }
  0xfc   : > { %730 = vst.msk [vmem:[#allocation2 + $0xa8] sm:$0xff] %vm708_vm4, %v655_v2  ;;  %v653_v14 = vpop.permute.xlu0 %652  ;;  %v1577_v2 = vld [vmem:[%s3839_s1 + $0x20] sm:$0xf] }
  0xfd   : > { %729 = vst.msk [vmem:[#allocation2 + $0xa0] sm:$0xff] %vm708_vm4, %v653_v14  ;;  %1310 = vrot.lane.b32.xlu1 %v3943_v12, %s2355_s6  ;;  %2191 = vmatprep.subr.bf16.mxu0 %v2190_v0 }
  0xfe   : > { %1278 = vrot.lane.b32.xlu0 %v2563_v38, %s2355_s6  ;;  %2198 = vmatprep.subr.bf16.mxu1 %v2190_v0 }
  0xff   : > { %v659_v44 = vpop.permute.xlu1 %658  ;;  %2193 = vmatpush3.bf16.msra.mxu0 %v2190_v0  ;;  %2201 = vmatpush3.bf16.msra.mxu1 %v2190_v0 }
 0x100   : > { %732 = vst.msk [vmem:[#allocation2 + $0xb8] sm:$0xff] %vm708_vm4, %v659_v44  ;;  %v657_v43 = vpop.permute.xlu0 %656 }
 0x101   : > { %731 = vst.msk [vmem:[#allocation2 + $0xb0] sm:$0xff] %vm708_vm4, %v657_v43  ;;  %1280 = vrot.lane.b32.xlu1 %v2548_v33, %s2355_s6  ;;  %v1576_v33 = vld [vmem:[%s3839_s1 + $0x18] sm:$0xff] }
 0x102   : > { %914 = vrot.lane.b32.xlu0 %v3943_v12, %s2352_s3  ;;  %v2194_v39 = vpack.c.bf16 %v1576_v33, %v1575_v47  ;;  %v3947_v33 = vld [vmem:[#allocation21_spill] sm:$0xff] }
 0x103   : > { %v663_v38 = vpop.permute.xlu1 %662 }
 0x104   : > { %734 = vst.msk [vmem:[#allocation2 + $0xc8] sm:$0xff] %vm708_vm4, %v663_v38  ;;  %v661_v1 = vpop.permute.xlu0 %660  ;;  %2195 = vmatprep.subr.bf16.mxu0 %v2194_v39  ;;  %2199 = vmatprep.subr.bf16.mxu1 %v2194_v39 }
 0x105   : > { %733 = vst.msk [vmem:[#allocation2 + $0xc0] sm:$0xff] %vm708_vm4, %v661_v1  ;;  %1412 = vrot.lane.b32.xlu1 %v2875_v15, %s2356_s25  ;;  %2197 = vmatpush3.bf16.msra.mxu0 %v2194_v39 }
 0x106   : > { %1312 = vrot.lane.b32.xlu0 %v3944_v10, %s2355_s6  ;;  %2202 = vmatpush3.bf16.msra.mxu1 %v2194_v39  ;;  %v3948_v39 = vld [vmem:[#allocation6_spill] sm:$0xff] }
 0x107   : > { %v667_v59 = vpop.permute.xlu1 %666  ;;  %2140 = vmatprep.subr.msk.mxu0 %vm1675_vm5, %v1577_v2  ;;  %2200 = vmatprep.subr.msk.mxu1 %vm1675_vm5, %v1577_v2 }
 0x108   : > { %736 = vst.msk [vmem:[#allocation2 + $0xd8] sm:$0xff] %vm708_vm4, %v667_v59  ;;  %v665_v34 = vpop.permute.xlu0 %664 }
 0x109   : > { %735 = vst.msk [vmem:[#allocation2 + $0xd0] sm:$0xff] %vm708_vm4, %v665_v34  ;;  %916 = vrot.lane.b32.xlu1 %v3944_v10, %s2352_s3  ;;  %2141 = vmatpush3.msk.msra.mxu0 %vm1675_vm5, %v1577_v2 }
 0x10a   : > { %1444 = vrot.lane.b32.xlu0 %v2979_v25, %s2356_s25  ;;  %2203 = vmatpush3.msk.msra.mxu1 %vm1675_vm5, %v1577_v2 }
 0x10b   : > { %v671_v14 = vpop.permute.xlu1 %670 }
 0x10c   : > { %738 = vst.msk [vmem:[#allocation2 + $0xe8] sm:$0xff] %vm708_vm4, %v671_v14  ;;  %v669_v12 = vpop.permute.xlu0 %668 }
 0x10d   : > { %737 = vst.msk [vmem:[#allocation2 + $0xe0] sm:$0xff] %vm708_vm4, %v669_v12  ;;  %1048 = vrot.lane.b32.xlu1 %v2979_v25, %s2353_s4 }
 0x10e   : > { %1016 = vrot.lane.b32.xlu0 %v2875_v15, %s2353_s4 }
 0x10f   : > { %v675_v44 = vpop.permute.xlu1 %674 }
 0x110   : > { %740 = vst.msk [vmem:[#allocation2 + $0xf8] sm:$0xff] %vm708_vm4, %v675_v44  ;;  %v673_v43 = vpop.permute.xlu0 %672 }
 0x111   : > { %739 = vst.msk [vmem:[#allocation2 + $0xf0] sm:$0xff] %vm708_vm4, %v673_v43  ;;  %1446 = vrot.lane.b32.xlu1 %v2974_v26, %s2356_s25 }
 0x112   : > { %1414 = vrot.lane.b32.xlu0 %v2870_v49, %s2356_s25 }
 0x113   : > { %v746_v11 = vpop.permute.xlu1 %745 }
 0x114   : > { %841 = vst.msk [vmem:[#allocation2 + $0x8] sm:$0xff] %vm839_vm6, %v746_v11  ;;  %v744_v25 = vpop.permute.xlu0 %743 }
 0x115   : > { %840 = vst.msk [vmem:[#allocation2] sm:$0xff] %vm839_vm6, %v744_v25  ;;  %1050 = vrot.lane.b32.xlu1 %v2974_v26, %s2353_s4 }
 0x116   : > { %1018 = vrot.lane.b32.xlu0 %v2870_v49, %s2353_s4 }
 0x117   : > { %v750_v15 = vpop.permute.xlu1 %749 }
 0x118   : > { %843 = vst.msk [vmem:[#allocation2 + $0x18] sm:$0xff] %vm839_vm6, %v750_v15  ;;  %v748_v20 = vpop.permute.xlu0 %747 }
 0x119   : > { %842 = vst.msk [vmem:[#allocation2 + $0x10] sm:$0xff] %vm839_vm6, %v748_v20  ;;  %1179 = vrot.lane.b32.xlu1 %v2595_v46, %s2354_s5  ;;  %v3946_v46 = vld [vmem:[#allocation7_spill] sm:$0xff] }
 0x11a   : > { %1147 = vrot.lane.b32.xlu0 %v2491_v18, %s2354_s5  ;;  %v3945_v18 = vld [vmem:[#allocation22_spill] sm:$0xff] }
 0x11b   : > { %v754_v0 = vpop.permute.xlu1 %753 }
 0x11c   : > { %845 = vst.msk [vmem:[#allocation2 + $0x28] sm:$0xff] %vm839_vm6, %v754_v0  ;;  %v752_v38 = vpop.permute.xlu0 %751 }
 0x11d   : > { %844 = vst.msk [vmem:[#allocation2 + $0x20] sm:$0xff] %vm839_vm6, %v752_v38  ;;  %1181 = vrot.lane.b32.xlu1 %v2592_v45, %s2354_s5 }
 0x11e   : > { %1149 = vrot.lane.b32.xlu0 %v2481_v16, %s2354_s5 }
 0x11f   : > { %v758_v49 = vpop.permute.xlu1 %757 }
 0x120   : > { %847 = vst.msk [vmem:[#allocation2 + $0x38] sm:$0xff] %vm839_vm6, %v758_v49  ;;  %v756_v26 = vpop.permute.xlu0 %755  ;;  %v3951_v49 = vld [vmem:[#allocation23_spill] sm:$0xff] }
 0x121   : > { %846 = vst.msk [vmem:[#allocation2 + $0x30] sm:$0xff] %vm839_vm6, %v756_v26  ;;  %1314 = vrot.lane.b32.xlu1 %v3945_v18, %s2355_s6  ;;  %v3952_v26 = vld [vmem:[#allocation8_spill] sm:$0xff] }
 0x122   : > { %1282 = vrot.lane.b32.xlu0 %v3946_v46, %s2355_s6 }
 0x123   : > { %v762_v1 = vpop.permute.xlu1 %761 }
 0x124   : > { %849 = vst.msk [vmem:[#allocation2 + $0x48] sm:$0xff] %vm839_vm6, %v762_v1  ;;  %v760_v47 = vpop.permute.xlu0 %759 }
 0x125   : > { %848 = vst.msk [vmem:[#allocation2 + $0x40] sm:$0xff] %vm839_vm6, %v760_v47  ;;  %918 = vrot.lane.b32.xlu1 %v3945_v18, %s2352_s3 }
 0x126   : > { %886 = vrot.lane.b32.xlu0 %v3946_v46, %s2352_s3 }
 0x127   : > { %v766_v16 = vpop.permute.xlu1 %765 }
 0x128   : > { %851 = vst.msk [vmem:[#allocation2 + $0x58] sm:$0xff] %vm839_vm6, %v766_v16  ;;  %v764_v45 = vpop.permute.xlu0 %763 }
 0x129   : > { %850 = vst.msk [vmem:[#allocation2 + $0x50] sm:$0xff] %vm839_vm6, %v764_v45  ;;  %1316 = vrot.lane.b32.xlu1 %v3947_v33, %s2355_s6 }
 0x12a   : > { %1284 = vrot.lane.b32.xlu0 %v3948_v39, %s2355_s6 }
 0x12b   : > { %v770_v10 = vpop.permute.xlu1 %769 }
 0x12c   : > { %853 = vst.msk [vmem:[#allocation2 + $0x68] sm:$0xff] %vm839_vm6, %v770_v10  ;;  %v768_v59 = vpop.permute.xlu0 %767 }
 0x12d   : > { %852 = vst.msk [vmem:[#allocation2 + $0x60] sm:$0xff] %vm839_vm6, %v768_v59  ;;  %1448 = vrot.lane.b32.xlu1 %v2992_v35, %s2356_s25 }
 0x12e   : > { %1416 = vrot.lane.b32.xlu0 %v2888_v27, %s2356_s25 }
 0x12f   : > { %v774_v34 = vpop.permute.xlu1 %773 }
 0x130   : > { %855 = vst.msk [vmem:[#allocation2 + $0x78] sm:$0xff] %vm839_vm6, %v774_v34  ;;  %v772_v2 = vpop.permute.xlu0 %771 }
 0x131   : > { %854 = vst.msk [vmem:[#allocation2 + $0x70] sm:$0xff] %vm839_vm6, %v772_v2  ;;  %920 = vrot.lane.b32.xlu1 %v3947_v33, %s2352_s3  ;;  %v3954_v2 = vld [vmem:[#allocation11_spill] sm:$0xff] }
 0x132   : > { %888 = vrot.lane.b32.xlu0 %v3948_v39, %s2352_s3 }
 0x133   : > { %v778_v14 = vpop.permute.xlu1 %777 }
 0x134   : > { %857 = vst.msk [vmem:[#allocation2 + $0x88] sm:$0xff] %vm839_vm6, %v778_v14  ;;  %v776_v12 = vpop.permute.xlu0 %775 }
 0x135   : > { %856 = vst.msk [vmem:[#allocation2 + $0x80] sm:$0xff] %vm839_vm6, %v776_v12  ;;  %1052 = vrot.lane.b32.xlu1 %v2992_v35, %s2353_s4 }
 0x136   : > { %1020 = vrot.lane.b32.xlu0 %v2888_v27, %s2353_s4 }
 0x137   : > { %v782_v44 = vpop.permute.xlu1 %781 }
 0x138   : > { %859 = vst.msk [vmem:[#allocation2 + $0x98] sm:$0xff] %vm839_vm6, %v782_v44  ;;  %v780_v43 = vpop.permute.xlu0 %779  ;;  %v3955_v44 = vld [vmem:[#allocation25_spill] sm:$0xff] }
 0x139   : > { %858 = vst.msk [vmem:[#allocation2 + $0x90] sm:$0xff] %vm839_vm6, %v780_v43  ;;  %1450 = vrot.lane.b32.xlu1 %v2987_v4, %s2356_s25  ;;  %v3956_v43 = vld [vmem:[#allocation10_spill] sm:$0xff] }
 0x13a   : > { %1418 = vrot.lane.b32.xlu0 %v2883_v5, %s2356_s25 }
 0x13b   : > { %v786_v11 = vpop.permute.xlu1 %785 }
 0x13c   : > { %861 = vst.msk [vmem:[#allocation2 + $0xa8] sm:$0xff] %vm839_vm6, %v786_v11  ;;  %v784_v25 = vpop.permute.xlu0 %783 }
 0x13d   : > { %860 = vst.msk [vmem:[#allocation2 + $0xa0] sm:$0xff] %vm839_vm6, %v784_v25  ;;  %1054 = vrot.lane.b32.xlu1 %v2987_v4, %s2353_s4 }
 0x13e   : > { %1022 = vrot.lane.b32.xlu0 %v2883_v5, %s2353_s4 }
 0x13f   : > { %v790_v27 = vpop.permute.xlu1 %789 }
 0x140   : > { %863 = vst.msk [vmem:[#allocation2 + $0xb8] sm:$0xff] %vm839_vm6, %v790_v27  ;;  %v788_v35 = vpop.permute.xlu0 %787  ;;  %v3957_v27 = vld [vmem:[#allocation32_spill] sm:$0xff] }
 0x141   : > { %862 = vst.msk [vmem:[#allocation2 + $0xb0] sm:$0xff] %vm839_vm6, %v788_v35  ;;  %1183 = vrot.lane.b32.xlu1 %v2612_v51, %s2354_s5  ;;  %v3950_v51 = vld [vmem:[#allocation9_spill] sm:$0xff] }
 0x142   : > { %1151 = vrot.lane.b32.xlu0 %v2505_v23, %s2354_s5  ;;  %v3949_v23 = vld [vmem:[#allocation24_spill] sm:$0xff] }
 0x143   : > { %v794_v15 = vpop.permute.xlu1 %793 }
 0x144   : > { %865 = vst.msk [vmem:[#allocation2 + $0xc8] sm:$0xff] %vm839_vm6, %v794_v15  ;;  %v792_v20 = vpop.permute.xlu0 %791 }
 0x145   : > { %864 = vst.msk [vmem:[#allocation2 + $0xc0] sm:$0xff] %vm839_vm6, %v792_v20  ;;  %1185 = vrot.lane.b32.xlu1 %v2609_v50, %s2354_s5 }
 0x146   : > { %1153 = vrot.lane.b32.xlu0 %v2494_v19, %s2354_s5 }
 0x147   : > { %v798_v5 = vpop.permute.xlu1 %797 }
 0x148   : > { %867 = vst.msk [vmem:[#allocation2 + $0xd8] sm:$0xff] %vm839_vm6, %v798_v5  ;;  %v796_v4 = vpop.permute.xlu0 %795 }
 0x149   : > { %866 = vst.msk [vmem:[#allocation2 + $0xd0] sm:$0xff] %vm839_vm6, %v796_v4  ;;  %1318 = vrot.lane.b32.xlu1 %v3949_v23, %s2355_s6 }
 0x14a   : > { %1286 = vrot.lane.b32.xlu0 %v3950_v51, %s2355_s6 }
 0x14b   : > { %v802_v0 = vpop.permute.xlu1 %801 }
 0x14c   : > { %869 = vst.msk [vmem:[#allocation2 + $0xe8] sm:$0xff] %vm839_vm6, %v802_v0  ;;  %v800_v38 = vpop.permute.xlu0 %799 }
 0x14d   : > { %868 = vst.msk [vmem:[#allocation2 + $0xe0] sm:$0xff] %vm839_vm6, %v800_v38  ;;  %922 = vrot.lane.b32.xlu1 %v3949_v23, %s2352_s3  ;;  %v3958_v38 = vld [vmem:[#allocation31_spill] sm:$0xff] }
 0x14e   : > { %890 = vrot.lane.b32.xlu0 %v3950_v51, %s2352_s3 }
 0x14f   : > { %v806_v19 = vpop.permute.xlu1 %805 }
 0x150   : > { %871 = vst.msk [vmem:[#allocation2 + $0xf8] sm:$0xff] %vm839_vm6, %v806_v19  ;;  %v804_v50 = vpop.permute.xlu0 %803 }
 0x151   : > { %870 = vst.msk [vmem:[#allocation2 + $0xf0] sm:$0xff] %vm839_vm6, %v804_v50  ;;  %1320 = vrot.lane.b32.xlu1 %v3951_v49, %s2355_s6 }
 0x152   : > { %1288 = vrot.lane.b32.xlu0 %v3952_v26, %s2355_s6 }
 0x153   : > { %v881_v18 = vpop.permute.xlu1 %880 }
 0x154   : > { %976 = vst.msk [vmem:[#allocation2 + $0x8] sm:$0xff] %vm974_vm7, %v881_v18  ;;  %v879_v46 = vpop.permute.xlu0 %878 }
 0x155   : > { %975 = vst.msk [vmem:[#allocation2] sm:$0xff] %vm974_vm7, %v879_v46  ;;  %1452 = vrot.lane.b32.xlu1 %v3005_v8, %s2356_s25 }
 0x156   : > { %1420 = vrot.lane.b32.xlu0 %v2901_v36, %s2356_s25 }
 0x157   : > { %v885_v1 = vpop.permute.xlu1 %884 }
 0x158   : > { %978 = vst.msk [vmem:[#allocation2 + $0x18] sm:$0xff] %vm974_vm7, %v885_v1  ;;  %v883_v47 = vpop.permute.xlu0 %882 }
 0x159   : > { %977 = vst.msk [vmem:[#allocation2 + $0x10] sm:$0xff] %vm974_vm7, %v883_v47  ;;  %924 = vrot.lane.b32.xlu1 %v3951_v49, %s2352_s3 }
 0x15a   : > { %892 = vrot.lane.b32.xlu0 %v3952_v26, %s2352_s3 }
 0x15b   : > { %v913_v16 = vpop.permute.xlu1 %912 }
 0x15c   : > { %992 = vst.msk [vmem:[#allocation2 + $0x88] sm:$0xff] %vm974_vm7, %v913_v16  ;;  %v911_v45 = vpop.permute.xlu0 %910 }
 0x15d   : > { %991 = vst.msk [vmem:[#allocation2 + $0x80] sm:$0xff] %vm974_vm7, %v911_v45  ;;  %1056 = vrot.lane.b32.xlu1 %v3005_v8, %s2353_s4 }
 0x15e   : > { %1024 = vrot.lane.b32.xlu0 %v2901_v36, %s2353_s4 }
 0x15f   : > { %v1045_v33 = vpop.permute.xlu1 %1044 }
 0x160   : > { %1125 = vst.msk [vmem:[#allocation2 + $0x80] sm:$0xff] %vm1108_vm8, %v1045_v33  ;;  %v1013_v39 = vpop.permute.xlu0 %1012  ;;  %v3961_v33 = vld [vmem:[#allocation27_spill] sm:$0xff] }
 0x161   : > { %1109 = vst.msk [vmem:[#allocation2] sm:$0xff] %vm1108_vm8, %v1013_v39  ;;  %1454 = vrot.lane.b32.xlu1 %v3000_v53, %s2356_s25  ;;  %v3962_v39 = vld [vmem:[#allocation12_spill] sm:$0xff] }
 0x162   : > { %1422 = vrot.lane.b32.xlu0 %v2896_v17, %s2356_s25 }
 0x163   : > { %v1047_v10 = vpop.permute.xlu1 %1046 }
 0x164   : > { %1126 = vst.msk [vmem:[#allocation2 + $0x88] sm:$0xff] %vm1108_vm8, %v1047_v10  ;;  %v1015_v8 = vpop.permute.xlu0 %1014 }
 0x165   : > { %1110 = vst.msk [vmem:[#allocation2 + $0x8] sm:$0xff] %vm1108_vm8, %v1015_v8  ;;  %1058 = vrot.lane.b32.xlu1 %v3000_v53, %s2353_s4 }
 0x166   : > { %1026 = vrot.lane.b32.xlu0 %v2896_v17, %s2353_s4 }
 0x167   : > { %v1176_v36 = vpop.permute.xlu1 %1175 }
 0x168   : > { %1256 = vst.msk [vmem:[#allocation2 + $0x80] sm:$0xff] %vm1239_vm9, %v1176_v36  ;;  %v1144_v59 = vpop.permute.xlu0 %1143  ;;  %v3963_v36 = vld [vmem:[#allocation34_spill] sm:$0xff] }
 0x169   : > { %1240 = vst.msk [vmem:[#allocation2] sm:$0xff] %vm1239_vm9, %v1144_v59  ;;  %1187 = vrot.lane.b32.xlu1 %v2633_v56, %s2354_s5 }
 0x16a   : > { %1155 = vrot.lane.b32.xlu0 %v2520_v28, %s2354_s5  ;;  %v3953_v28 = vld [vmem:[#allocation26_spill] sm:$0xff] }
 0x16b   : > { %v1178_v34 = vpop.permute.xlu1 %1177 }
 0x16c   : > { %1257 = vst.msk [vmem:[#allocation2 + $0x88] sm:$0xff] %vm1239_vm9, %v1178_v34  ;;  %v1146_v53 = vpop.permute.xlu0 %1145 }
 0x16d   : > { %1241 = vst.msk [vmem:[#allocation2 + $0x8] sm:$0xff] %vm1239_vm9, %v1146_v53  ;;  %1189 = vrot.lane.b32.xlu1 %v2626_v55, %s2354_s5 }
 0x16e   : > { %1157 = vrot.lane.b32.xlu0 %v2508_v24, %s2354_s5 }
 0x16f   : > { %v1311_v17 = vpop.permute.xlu1 %1310 }
 0x170   : > { %1391 = vst.msk [vmem:[#allocation2 + $0x80] sm:$0xff] %vm1374_vm10, %v1311_v17  ;;  %v1279_v56 = vpop.permute.xlu0 %1278 }
 0x171   : > { %1375 = vst.msk [vmem:[#allocation2] sm:$0xff] %vm1374_vm10, %v1279_v56  ;;  %1322 = vrot.lane.b32.xlu1 %v3953_v28, %s2355_s6 }
 0x172   : > { %1290 = vrot.lane.b32.xlu0 %v3954_v2, %s2355_s6 }
 0x173   : > { %v1281_v14 = vpop.permute.xlu1 %1280 }
 0x174   : > { %1376 = vst.msk [vmem:[#allocation2 + $0x8] sm:$0xff] %vm1374_vm10, %v1281_v14  ;;  %v915_v55 = vpop.permute.xlu0 %914 }
 0x175   : > { %993 = vst.msk [vmem:[#allocation2 + $0x90] sm:$0xff] %vm974_vm7, %v915_v55  ;;  %926 = vrot.lane.b32.xlu1 %v3953_v28, %s2352_s3  ;;  %v3964_v55 = vld [vmem:[#allocation33_spill] sm:$0xff] }
 0x176   : > { %894 = vrot.lane.b32.xlu0 %v3954_v2, %s2352_s3 }
 0x177   : > { %v1413_v24 = vpop.permute.xlu1 %1412 }
 0x178   : > { %1509 = vst.msk [vmem:[#allocation2] sm:$0xff] %vm1508_vm11, %v1413_v24  ;;  %v1313_v12 = vpop.permute.xlu0 %1312 }
 0x179   : > { %1392 = vst.msk [vmem:[#allocation2 + $0x88] sm:$0xff] %vm1374_vm10, %v1313_v12  ;;  %1324 = vrot.lane.b32.xlu1 %v3955_v44, %s2355_s6 }
 0x17a   : > { %1292 = vrot.lane.b32.xlu0 %v3956_v43, %s2355_s6 }
 0x17b   : > { %v917_v11 = vpop.permute.xlu1 %916 }
 0x17c   : > { %994 = vst.msk [vmem:[#allocation2 + $0x98] sm:$0xff] %vm974_vm7, %v917_v11  ;;  %v1445_v25 = vpop.permute.xlu0 %1444 }
 0x17d   : > { %1525 = vst.msk [vmem:[#allocation2 + $0x80] sm:$0xff] %vm1508_vm11, %v1445_v25  ;;  %1456 = vrot.lane.b32.xlu1 %v3018_v61, %s2356_s25 }
 0x17e   : > { %1424 = vrot.lane.b32.xlu0 %v3957_v27, %s2356_s25 }
 0x17f   : > { %v1049_v35 = vpop.permute.xlu1 %1048  ;;  %v1541_v15 = vld [vmem:[#allocation2] sm:$0xff] }
 0x180   : > { %1127 = vst.msk [vmem:[#allocation2 + $0x90] sm:$0xff] %vm1108_vm8, %v1049_v35  ;;  %v1017_v20 = vpop.permute.xlu0 %1016  ;;  %2142 = vmatprep.mubr.msk.f32.mxu0 %vm1578_vm12, %v1541_v15 }
 0x181   : > { %1111 = vst.msk [vmem:[#allocation2 + $0x10] sm:$0xff] %vm1108_vm8, %v1017_v20  ;;  %928 = vrot.lane.b32.xlu1 %v3955_v44, %s2352_s3 }
 0x182   : > { %896 = vrot.lane.b32.xlu0 %v3956_v43, %s2352_s3 }
 0x183   : > { %v1447_v5 = vpop.permute.xlu1 %1446 }
 0x184   : > { %1526 = vst.msk [vmem:[#allocation2 + $0x88] sm:$0xff] %vm1508_vm11, %v1447_v5  ;;  %v1415_v4 = vpop.permute.xlu0 %1414  ;;  %v1557_v23 = vld [vmem:[#allocation2 + $0x80] sm:$0xff]  ;;  %v3967_v5 = vld [vmem:[#allocation29_spill] sm:$0xff] }
 0x185   : > { %1510 = vst.msk [vmem:[#allocation2 + $0x8] sm:$0xff] %vm1508_vm11, %v1415_v4  ;;  %2166 = vmatprep.mubr.msk.f32.mxu1 %vm1578_vm12, %v1557_v23  ;;  %1060 = vrot.lane.b32.xlu1 %v3018_v61, %s2353_s4  ;;  %v3968_v4 = vld [vmem:[#allocation14_spill] sm:$0xff] }
 0x186   : > { %1028 = vrot.lane.b32.xlu0 %v3957_v27, %s2353_s4 }
 0x187   : > { %v1051_v51 = vpop.permute.xlu1 %1050 }
 0x188   : > { %1128 = vst.msk [vmem:[#allocation2 + $0x98] sm:$0xff] %vm1108_vm8, %v1051_v51  ;;  %v1019_v0 = vpop.permute.xlu0 %1018 }
 0x189   : > { %1112 = vst.msk [vmem:[#allocation2 + $0x18] sm:$0xff] %vm1108_vm8, %v1019_v0  ;;  %1458 = vrot.lane.b32.xlu1 %v3013_v52, %s2356_s25  ;;  %v3969_v0 = vld [vmem:[#allocation36_spill] sm:$0xff] }
 0x18a   : > { %1426 = vrot.lane.b32.xlu0 %v3958_v38, %s2356_s25 }
 0x18b   : > { %v1180_v19 = vpop.permute.xlu1 %1179  ;;  %v1558_v50 = vld [vmem:[#allocation2 + $0x88] sm:$0xff] }
 0x18c   : > { %1258 = vst.msk [vmem:[#allocation2 + $0x90] sm:$0xff] %vm1239_vm9, %v1180_v19  ;;  %v1148_v61 = vpop.permute.xlu0 %1147  ;;  %v1542_v49 = vld [vmem:[#allocation2 + $0x8] sm:$0xff]  ;;  %2167 = vmatmul.mubr.msk.f32.vlgmr.msra.gmra.mrb[0].mxu1 %vm1578_vm12, %v1558_v50 }
 0x18d   : > { %1242 = vst.msk [vmem:[#allocation2 + $0x10] sm:$0xff] %vm1239_vm9, %v1148_v61  ;;  %2143 = vmatmul.mubr.msk.f32.vlgmr.msra.gmra.mrb[0].mxu0 %vm1578_vm12, %v1542_v49  ;;  %1062 = vrot.lane.b32.xlu1 %v3013_v52, %s2353_s4 }
 0x18e   : > { %1030 = vrot.lane.b32.xlu0 %v3958_v38, %s2353_s4 }
 0x18f   : > { %v1182_v26 = vpop.permute.xlu1 %1181 }
 0x190   : > { %1259 = vst.msk [vmem:[#allocation2 + $0x98] sm:$0xff] %vm1239_vm9, %v1182_v26  ;;  %v1150_v18 = vpop.permute.xlu0 %1149 }
 0x191   : > { %1243 = vst.msk [vmem:[#allocation2 + $0x18] sm:$0xff] %vm1239_vm9, %v1150_v18  ;;  %1191 = vrot.lane.b32.xlu1 %v2643_v58, %s2354_s5  ;;  %v3960_v58 = vld [vmem:[#allocation13_spill] sm:$0xff] }
 0x192   : > { %1159 = vrot.lane.b32.xlu0 %v2530_v30, %s2354_s5  ;;  %v3959_v30 = vld [vmem:[#allocation28_spill] sm:$0xff] }
 0x193   : > { %v1315_v46 = vpop.permute.xlu1 %1314 }
 0x194   : > { %1393 = vst.msk [vmem:[#allocation2 + $0x90] sm:$0xff] %vm1374_vm10, %v1315_v46  ;;  %v1283_v1 = vpop.permute.xlu0 %1282 }
 0x195   : > { %1377 = vst.msk [vmem:[#allocation2 + $0x10] sm:$0xff] %vm1374_vm10, %v1283_v1  ;;  %1193 = vrot.lane.b32.xlu1 %v2640_v57, %s2354_s5  ;;  %v3970_v1 = vld [vmem:[#allocation35_spill] sm:$0xff] }
 0x196   : > { %1161 = vrot.lane.b32.xlu0 %v2527_v29, %s2354_s5 }
 0x197   : > { %v919_v52 = vpop.permute.xlu1 %918 }
 0x198   : > { %995 = vst.msk [vmem:[#allocation2 + $0xa0] sm:$0xff] %vm974_vm7, %v919_v52  ;;  %v887_v47 = vpop.permute.xlu0 %886 }
 0x199   : > { %979 = vst.msk [vmem:[#allocation2 + $0x20] sm:$0xff] %vm974_vm7, %v887_v47  ;;  %1326 = vrot.lane.b32.xlu1 %v3959_v30, %s2355_s6 }
 0x19a   : > { %1294 = vrot.lane.b32.xlu0 %v3960_v58, %s2355_s6 }
 0x19b   : > { %v1317_v16 = vpop.permute.xlu1 %1316 }
 0x19c   : > { %1394 = vst.msk [vmem:[#allocation2 + $0x98] sm:$0xff] %vm1374_vm10, %v1317_v16  ;;  %v1285_v45 = vpop.permute.xlu0 %1284 }
 0x19d   : > { %1378 = vst.msk [vmem:[#allocation2 + $0x18] sm:$0xff] %vm1374_vm10, %v1285_v45  ;;  %930 = vrot.lane.b32.xlu1 %v3959_v30, %s2352_s3  ;;  %v874_v45 = vrot.slane %v3145_v3, 1 }
 0x19e   : > { %898 = vrot.lane.b32.xlu0 %v3960_v58, %s2352_s3 }
 0x19f   : > { %v1449_v29 = vpop.permute.xlu1 %1448 }
 0x1a0   : > { %1527 = vst.msk [vmem:[#allocation2 + $0x90] sm:$0xff] %vm1508_vm11, %v1449_v29  ;;  %v1417_v57 = vpop.permute.xlu0 %1416  ;;  %v873_v29 = vrot.slane %v3148_v21, 1 }
 0x1a1   : > { %1511 = vst.msk [vmem:[#allocation2 + $0x10] sm:$0xff] %vm1508_vm11, %v1417_v57  ;;  %1328 = vrot.lane.b32.xlu1 %v3961_v33, %s2355_s6 }
 0x1a2   : > { %1296 = vrot.lane.b32.xlu0 %v3962_v39, %s2355_s6 }
 0x1a3   : > { %v921_v10 = vpop.permute.xlu1 %920 }
 0x1a4   : > { %996 = vst.msk [vmem:[#allocation2 + $0xa8] sm:$0xff] %vm974_vm7, %v921_v10  ;;  %v889_v8 = vpop.permute.xlu0 %888  ;;  %v236_v10 = vld [vmem:[%s2434_s27 + $0x190] sm:$0x3] }
 0x1a5   : > { %980 = vst.msk [vmem:[#allocation2 + $0x28] sm:$0xff] %vm974_vm7, %v889_v8  ;;  %1460 = vrot.lane.b32.xlu1 %v3033_v54, %s2356_s25 }
 0x1a6   : > { %1428 = vrot.lane.b32.xlu0 %v3963_v36, %s2356_s25 }
 0x1a7   : > { %v1053_v59 = vpop.permute.xlu1 %1052  ;;  %v1559_v34 = vld [vmem:[#allocation2 + $0x90] sm:$0xff] }
 0x1a8   : > { %1129 = vst.msk [vmem:[#allocation2 + $0xa0] sm:$0xff] %vm1108_vm8, %v1053_v59  ;;  %v1021_v53 = vpop.permute.xlu0 %1020  ;;  %v1543_v17 = vld [vmem:[#allocation2 + $0x10] sm:$0xff]  ;;  %2169 = vmatprep.mubr.msk.f32.mxu1 %vm1578_vm12, %v1559_v34 }
 0x1a9   : > { %1113 = vst.msk [vmem:[#allocation2 + $0x20] sm:$0xff] %vm1108_vm8, %v1021_v53  ;;  %2145 = vmatprep.mubr.msk.f32.mxu0 %vm1578_vm12, %v1543_v17  ;;  %932 = vrot.lane.b32.xlu1 %v3961_v33, %s2352_s3  ;;  %v875_v33 = vsel %vm321_vm1, %v873_v29, %v874_v45  ;;  %v1007_v53 = vrot.slane %v3148_v21, 2 }
 0x1aa   : > { %900 = vrot.lane.b32.xlu0 %v3962_v39, %s2352_s3 }
 0x1ab   : > { %v1451_v56 = vpop.permute.xlu1 %1450 }
 0x1ac   : > { %1528 = vst.msk [vmem:[#allocation2 + $0x98] sm:$0xff] %vm1508_vm11, %v1451_v56  ;;  %v1419_v28 = vpop.permute.xlu0 %1418 }
 0x1ad   : > { %1512 = vst.msk [vmem:[#allocation2 + $0x18] sm:$0xff] %vm1508_vm11, %v1419_v28  ;;  %1064 = vrot.lane.b32.xlu1 %v3033_v54, %s2353_s4 }
 0x1ae   : > { %1032 = vrot.lane.b32.xlu0 %v3963_v36, %s2353_s4  ;;  %v876_v36 = vrot.slane %v236_v10, 1 }
 0x1af   : > { %v1055_v2 = vpop.permute.xlu1 %1054 }
 0x1b0   : > { %1130 = vst.msk [vmem:[#allocation2 + $0xa8] sm:$0xff] %vm1108_vm8, %v1055_v2  ;;  %v1023_v14 = vpop.permute.xlu0 %1022  ;;  %v877_v17 = vsel %vm321_vm1, %v874_v45, %v876_v36  ;;  %v3972_v2 = vld [vmem:[#allocation16_spill] sm:$0xff] }
 0x1b1   : > { %1114 = vst.msk [vmem:[#allocation2 + $0x28] sm:$0xff] %vm1108_vm8, %v1023_v14  ;;  %1462 = vrot.lane.b32.xlu1 %v3028_v22, %s2356_s25 }
 0x1b2   : > { %1430 = vrot.lane.b32.xlu0 %v3964_v55, %s2356_s25 }
 0x1b3   : > { %v1184_v24 = vpop.permute.xlu1 %1183  ;;  %v1560_v12 = vld [vmem:[#allocation2 + $0x98] sm:$0xff] }
 0x1b4   : > { %1260 = vst.msk [vmem:[#allocation2 + $0xa0] sm:$0xff] %vm1239_vm9, %v1184_v24  ;;  %v1152_v54 = vpop.permute.xlu0 %1151  ;;  %v1544_v44 = vld [vmem:[#allocation2 + $0x18] sm:$0xff]  ;;  %2170 = vmatmul.mubr.msk.f32.gmra.mrb[2].mxu1 %vm1578_vm12, %v1560_v12 }
 0x1b5   : > { %1244 = vst.msk [vmem:[#allocation2 + $0x20] sm:$0xff] %vm1239_vm9, %v1152_v54  ;;  %2146 = vmatmul.mubr.msk.f32.gmra.mrb[2].mxu0 %vm1578_vm12, %v1544_v44  ;;  %1066 = vrot.lane.b32.xlu1 %v3028_v22, %s2353_s4 }
 0x1b6   : > { %1034 = vrot.lane.b32.xlu0 %v3964_v55, %s2353_s4  ;;  %v3973_v55 = vld [vmem:[#allocation38_spill] sm:$0xff] }
 0x1b7   : > { %v1186_v43 = vpop.permute.xlu1 %1185 }
 0x1b8   : > { %1261 = vst.msk [vmem:[#allocation2 + $0xa8] sm:$0xff] %vm1239_vm9, %v1186_v43  ;;  %v1154_v11 = vpop.permute.xlu0 %1153  ;;  %v1010_v43 = vrot.slane %v236_v10, 2 }
 0x1b9   : > { %1245 = vst.msk [vmem:[#allocation2 + $0x28] sm:$0xff] %vm1239_vm9, %v1154_v11  ;;  %1195 = vrot.lane.b32.xlu1 %v2658_v63, %s2354_s5  ;;  %v3966_v63 = vld [vmem:[#allocation15_spill] sm:$0xff] }
 0x1ba   : > { %1163 = vrot.lane.b32.xlu0 %v2540_v32, %s2354_s5  ;;  %v3965_v32 = vld [vmem:[#allocation30_spill] sm:$0xff] }
 0x1bb   : > { %v1319_v25 = vpop.permute.xlu1 %1318 }
 0x1bc   : > { %1395 = vst.msk [vmem:[#allocation2 + $0xa0] sm:$0xff] %vm1374_vm10, %v1319_v25  ;;  %v1287_v27 = vpop.permute.xlu0 %1286 }
 0x1bd   : > { %1379 = vst.msk [vmem:[#allocation2 + $0x20] sm:$0xff] %vm1374_vm10, %v1287_v27  ;;  %1197 = vrot.lane.b32.xlu1 %v2655_v62, %s2354_s5 }
 0x1be   : > { %1165 = vrot.lane.b32.xlu0 %v2537_v31, %s2354_s5 }
 0x1bf   : > { %v923_v22 = vpop.permute.xlu1 %922 }
 0x1c0   : > { %997 = vst.msk [vmem:[#allocation2 + $0xb0] sm:$0xff] %vm974_vm7, %v923_v22  ;;  %v891_v35 = vpop.permute.xlu0 %890 }
 0x1c1   : > { %981 = vst.msk [vmem:[#allocation2 + $0x30] sm:$0xff] %vm974_vm7, %v891_v35  ;;  %1330 = vrot.lane.b32.xlu1 %v3965_v32, %s2355_s6 }
 0x1c2   : > { %1298 = vrot.lane.b32.xlu0 %v3966_v63, %s2355_s6 }
 0x1c3   : > { %v1321_v15 = vpop.permute.xlu1 %1320 }
 0x1c4   : > { %1396 = vst.msk [vmem:[#allocation2 + $0xa8] sm:$0xff] %vm1374_vm10, %v1321_v15  ;;  %v1289_v20 = vpop.permute.xlu0 %1288 }
 0x1c5   : > { %1380 = vst.msk [vmem:[#allocation2 + $0x28] sm:$0xff] %vm1374_vm10, %v1289_v20  ;;  %934 = vrot.lane.b32.xlu1 %v3965_v32, %s2352_s3  ;;  %v3974_v32 = vld [vmem:[#allocation37_spill] sm:$0xff] }
 0x1c6   : > { %902 = vrot.lane.b32.xlu0 %v3966_v63, %s2352_s3 }
 0x1c7   : > { %v1453_v31 = vpop.permute.xlu1 %1452 }
 0x1c8   : > { %1529 = vst.msk [vmem:[#allocation2 + $0xa0] sm:$0xff] %vm1508_vm11, %v1453_v31  ;;  %v1421_v62 = vpop.permute.xlu0 %1420 }
 0x1c9   : > { %1513 = vst.msk [vmem:[#allocation2 + $0x20] sm:$0xff] %vm1508_vm11, %v1421_v62  ;;  %1332 = vrot.lane.b32.xlu1 %v3967_v5, %s2355_s6  ;;  %v237_v62 = vld [vmem:[%s2434_s27 + $0x198] sm:$0xff] }
 0x1ca   : > { %1300 = vrot.lane.b32.xlu0 %v3968_v4, %s2355_s6 }
 0x1cb   : > { %v925_v23 = vpop.permute.xlu1 %924 }
 0x1cc   : > { %998 = vst.msk [vmem:[#allocation2 + $0xb8] sm:$0xff] %vm974_vm7, %v925_v23  ;;  %v893_v51 = vpop.permute.xlu0 %892 }
 0x1cd   : > { %982 = vst.msk [vmem:[#allocation2 + $0x38] sm:$0xff] %vm974_vm7, %v893_v51  ;;  %1464 = vrot.lane.b32.xlu1 %v3046_v48, %s2356_s25  ;;  %v1273_v51 = vrot.slane %v237_v62, 1 }
 0x1ce   : > { %1432 = vrot.lane.b32.xlu0 %v3969_v0, %s2356_s25 }
 0x1cf   : > { %v1057_v38 = vpop.permute.xlu1 %1056  ;;  %v1561_v19 = vld [vmem:[#allocation2 + $0xa0] sm:$0xff] }
 0x1d0   : > { %1131 = vst.msk [vmem:[#allocation2 + $0xb0] sm:$0xff] %vm1108_vm8, %v1057_v38  ;;  %v1025_v50 = vpop.permute.xlu0 %1024  ;;  %v1545_v61 = vld [vmem:[#allocation2 + $0x20] sm:$0xff]  ;;  %2172 = vmatprep.mubr.msk.f32.mxu1 %vm1578_vm12, %v1561_v19  ;;  %v239_v19 = vld [vmem:[%s2434_s27 + $0x1a8] sm:$0x3] }
 0x1d1   : > { %1115 = vst.msk [vmem:[#allocation2 + $0x30] sm:$0xff] %vm1108_vm8, %v1025_v50  ;;  %2148 = vmatprep.mubr.msk.f32.mxu0 %vm1578_vm12, %v1545_v61  ;;  %936 = vrot.lane.b32.xlu1 %v3967_v5, %s2352_s3 }
 0x1d2   : > { %904 = vrot.lane.b32.xlu0 %v3968_v4, %s2352_s3  ;;  %v238_v4 = vld [vmem:[%s2434_s27 + $0x1a0] sm:$0xff]  ;;  %s170_s27 = sand.u32 1, %s2331_s10  }
 0x1d3   : > { %v1455_v49 = vpop.permute.xlu1 %1454  ;;  %s2054_s30 = sshll.u32 %s170_s27, 8 }
 0x1d4   : > { %1530 = vst.msk [vmem:[#allocation2 + $0xa8] sm:$0xff] %vm1508_vm11, %v1455_v49  ;;  %v1423_v26 = vpop.permute.xlu0 %1422  ;;  %v1276_v49 = vrot.slane %v239_v19, 1 }
 0x1d5   : > { %1514 = vst.msk [vmem:[#allocation2 + $0x28] sm:$0xff] %vm1508_vm11, %v1423_v26  ;;  %1068 = vrot.lane.b32.xlu1 %v3046_v48, %s2353_s4 }
 0x1d6   : > { %1036 = vrot.lane.b32.xlu0 %v3969_v0, %s2353_s4  ;;  %v1274_v0 = vrot.slane %v238_v4, 1 }
 0x1d7   : > { %v1059_v18 = vpop.permute.xlu1 %1058 }
 0x1d8   : > { %1132 = vst.msk [vmem:[#allocation2 + $0xb8] sm:$0xff] %vm1108_vm8, %v1059_v18  ;;  %v1027_v46 = vpop.permute.xlu0 %1026  ;;  %v1275_v61 = vsel %vm321_vm1, %v1273_v51, %v1274_v0  ;;  %v1407_v18 = vrot.slane %v237_v62, 2 }
 0x1d9   : > { %1116 = vst.msk [vmem:[#allocation2 + $0x38] sm:$0xff] %vm1108_vm8, %v1027_v46  ;;  %1466 = vrot.lane.b32.xlu1 %v3043_v6, %s2356_s25  ;;  %v1408_v46 = vrot.slane %v238_v4, 2 }
 0x1da   : > { %1434 = vrot.lane.b32.xlu0 %v3970_v1, %s2356_s25 }
 0x1db   : > { %v1188_v52 = vpop.permute.xlu1 %1187  ;;  %v1562_v47 = vld [vmem:[#allocation2 + $0xa8] sm:$0xff] }
 0x1dc   : > { %1262 = vst.msk [vmem:[#allocation2 + $0xb0] sm:$0xff] %vm1239_vm9, %v1188_v52  ;;  %v1156_v48 = vpop.permute.xlu0 %1155  ;;  %v1546_v30 = vld [vmem:[#allocation2 + $0x28] sm:$0xff]  ;;  %2173 = vmatmul.mubr.msk.f32.gmra.mrb[4].mxu1 %vm1578_vm12, %v1562_v47  ;;  %v1409_v47 = vsel %vm531_vm2, %v1407_v18, %v1408_v46 }
 0x1dd   : > { %1246 = vst.msk [vmem:[#allocation2 + $0x30] sm:$0xff] %vm1239_vm9, %v1156_v48  ;;  %2149 = vmatmul.mubr.msk.f32.gmra.mrb[4].mxu0 %vm1578_vm12, %v1546_v30  ;;  %1070 = vrot.lane.b32.xlu1 %v3043_v6, %s2353_s4  ;;  %v1410_v48 = vrot.slane %v239_v19, 2 }
 0x1de   : > { %1038 = vrot.lane.b32.xlu0 %v3970_v1, %s2353_s4  ;;  %v1277_v1 = vsel %vm321_vm1, %v1274_v0, %v1276_v49 }
 0x1df   : > { %v1190_v58 = vpop.permute.xlu1 %1189 }
 0x1e0   : > { %1263 = vst.msk [vmem:[#allocation2 + $0xb8] sm:$0xff] %vm1239_vm9, %v1190_v58  ;;  %v1158_v16 = vpop.permute.xlu0 %1157  ;;  %v1411_v58 = vsel %vm531_vm2, %v1408_v46, %v1410_v48 }
 0x1e1   : > { %1247 = vst.msk [vmem:[#allocation2 + $0x38] sm:$0xff] %vm1239_vm9, %v1158_v16  ;;  %1199 = vrot.lane.b32.xlu1 %v3148_v21, %s2354_s5 }
 0x1e2   : > { %1167 = vrot.lane.b32.xlu0 %v2567_v40, %s2354_s5  ;;  %v3971_v40 = vld [vmem:[#allocation17_spill] sm:$0xff] }
 0x1e3   : > { %v1323_v6 = vpop.permute.xlu1 %1322 }
 0x1e4   : > { %1397 = vst.msk [vmem:[#allocation2 + $0xb0] sm:$0xff] %vm1374_vm10, %v1323_v6  ;;  %v1291_v57 = vpop.permute.xlu0 %1290 }
 0x1e5   : > { %1381 = vst.msk [vmem:[#allocation2 + $0x30] sm:$0xff] %vm1374_vm10, %v1291_v57  ;;  %1201 = vrot.lane.b32.xlu1 %v3145_v3, %s2354_s5 }
 0x1e6   : > { %1169 = vrot.lane.b32.xlu0 %v2556_v37, %s2354_s5  ;;  %v1008_v37 = vrot.slane %v3145_v3, 2 }
 0x1e7   : > { %v927_v39 = vpop.permute.xlu1 %926 }
 0x1e8   : > { %999 = vst.msk [vmem:[#allocation2 + $0xc0] sm:$0xff] %vm974_vm7, %v927_v39  ;;  %v895_v8 = vpop.permute.xlu0 %894  ;;  %v1009_v3 = vsel %vm531_vm2, %v1007_v53, %v1008_v37  ;;  %v1011_v27 = vsel %vm531_vm2, %v1008_v37, %v1010_v43 }
 0x1e9   : > { %983 = vst.msk [vmem:[#allocation2 + $0x40] sm:$0xff] %vm974_vm7, %v895_v8  ;;  %1334 = vrot.lane.b32.xlu1 %v875_v33, %s2355_s6 }
 0x1ea   : > { %1302 = vrot.lane.b32.xlu0 %v3971_v40, %s2355_s6 }
 0x1eb   : > { %v1325_v59 = vpop.permute.xlu1 %1324 }
 0x1ec   : > { %1398 = vst.msk [vmem:[#allocation2 + $0xb8] sm:$0xff] %vm1374_vm10, %v1325_v59  ;;  %v1293_v34 = vpop.permute.xlu0 %1292 }
 0x1ed   : > { %1382 = vst.msk [vmem:[#allocation2 + $0x38] sm:$0xff] %vm1374_vm10, %v1293_v34  ;;  %938 = vrot.lane.b32.xlu1 %v875_v33, %s2352_s3 }
 0x1ee   : > { %906 = vrot.lane.b32.xlu0 %v3971_v40, %s2352_s3 }
 0x1ef   : > { %v1457_v56 = vpop.permute.xlu1 %1456 }
 0x1f0   : > { %1531 = vst.msk [vmem:[#allocation2 + $0xb0] sm:$0xff] %vm1508_vm11, %v1457_v56  ;;  %v1425_v28 = vpop.permute.xlu0 %1424 }
 0x1f1   : > { %1515 = vst.msk [vmem:[#allocation2 + $0x30] sm:$0xff] %vm1508_vm11, %v1425_v28  ;;  %1336 = vrot.lane.b32.xlu1 %v877_v17, %s2355_s6 }
 0x1f2   : > { %1304 = vrot.lane.b32.xlu0 %v3972_v2, %s2355_s6 }
 0x1f3   : > { %v929_v14 = vpop.permute.xlu1 %928 }
 0x1f4   : > { %1000 = vst.msk [vmem:[#allocation2 + $0xc8] sm:$0xff] %vm974_vm7, %v929_v14  ;;  %v897_v21 = vpop.permute.xlu0 %896 }
 0x1f5   : > { %984 = vst.msk [vmem:[#allocation2 + $0x48] sm:$0xff] %vm974_vm7, %v897_v21  ;;  %1468 = vrot.lane.b32.xlu1 %v1009_v3, %s2356_s25 }
 0x1f6   : > { %1436 = vrot.lane.b32.xlu0 %v3973_v55, %s2356_s25 }
 0x1f7   : > { %v1061_v24 = vpop.permute.xlu1 %1060  ;;  %v1563_v12 = vld [vmem:[#allocation2 + $0xb0] sm:$0xff] }
 0x1f8   : > { %1133 = vst.msk [vmem:[#allocation2 + $0xc0] sm:$0xff] %vm1108_vm8, %v1061_v24  ;;  %v1029_v54 = vpop.permute.xlu0 %1028  ;;  %v1547_v44 = vld [vmem:[#allocation2 + $0x30] sm:$0xff]  ;;  %2175 = vmatprep.mubr.msk.f32.mxu1 %vm1578_vm12, %v1563_v12 }
 0x1f9   : > { %1117 = vst.msk [vmem:[#allocation2 + $0x40] sm:$0xff] %vm1108_vm8, %v1029_v54  ;;  %2151 = vmatprep.mubr.msk.f32.mxu0 %vm1578_vm12, %v1547_v44  ;;  %940 = vrot.lane.b32.xlu1 %v877_v17, %s2352_s3 }
 0x1fa   : > { %908 = vrot.lane.b32.xlu0 %v3972_v2, %s2352_s3  ;;  %s3713_s3 = scalar_lea.vmem [#allocation3], %s2054_s30 }
 0x1fb   : > { %v1459_v11 = vpop.permute.xlu1 %1458 }
 0x1fc   : > { %1532 = vst.msk [vmem:[#allocation2 + $0xb8] sm:$0xff] %vm1508_vm11, %v1459_v11  ;;  %v1427_v25 = vpop.permute.xlu0 %1426 }
 0x1fd   : > { %1516 = vst.msk [vmem:[#allocation2 + $0x38] sm:$0xff] %vm1508_vm11, %v1427_v25  ;;  %1072 = vrot.lane.b32.xlu1 %v1009_v3, %s2353_s4 }
 0x1fe   : > { %1040 = vrot.lane.b32.xlu0 %v3973_v55, %s2353_s4 }
 0x1ff   : > { %v1063_v22 = vpop.permute.xlu1 %1062 }
 0x200   : > { %1134 = vst.msk [vmem:[#allocation2 + $0xc8] sm:$0xff] %vm1108_vm8, %v1063_v22  ;;  %v1031_v35 = vpop.permute.xlu0 %1030 }
 0x201   : > { %1118 = vst.msk [vmem:[#allocation2 + $0x48] sm:$0xff] %vm1108_vm8, %v1031_v35  ;;  %1470 = vrot.lane.b32.xlu1 %v1011_v27, %s2356_s25 }
 0x202   : > { %1438 = vrot.lane.b32.xlu0 %v3974_v32, %s2356_s25 }
 0x203   : > { %v1192_v63 = vpop.permute.xlu1 %1191  ;;  %v1564_v15 = vld [vmem:[#allocation2 + $0xb8] sm:$0xff] }
 0x204   : > { %1264 = vst.msk [vmem:[#allocation2 + $0xc0] sm:$0xff] %vm1239_vm9, %v1192_v63  ;;  %v1160_v20 = vpop.permute.xlu0 %1159  ;;  %v1548_v31 = vld [vmem:[#allocation2 + $0x38] sm:$0xff]  ;;  %2176 = vmatmul.mubr.msk.f32.gmra.mrb[6].mxu1 %vm1578_vm12, %v1564_v15 }
 0x205   : > { %1248 = vst.msk [vmem:[#allocation2 + $0x40] sm:$0xff] %vm1239_vm9, %v1160_v20  ;;  %2152 = vmatmul.mubr.msk.f32.gmra.mrb[6].mxu0 %vm1578_vm12, %v1548_v31  ;;  %1074 = vrot.lane.b32.xlu1 %v1011_v27, %s2353_s4 }
 0x206   : > { %1042 = vrot.lane.b32.xlu0 %v3974_v32, %s2353_s4  ;;  %s2094_s4 = sshll.u32 %s2339_s12, 12  ;;  %s3791_s12 = scalar_lea.sflag [#allocation4], %s170_s27 }
 0x207   : > { %v1194_v5 = vpop.permute.xlu1 %1193  ;;  %s3781_s8 = scalar_lea.hbm %s3840_s2, %s2094_s4 }
 0x208   : > { %1265 = vst.msk [vmem:[#allocation2 + $0xc8] sm:$0xff] %vm1239_vm9, %v1194_v5  ;;  %v1162_v23 = vpop.permute.xlu0 %1161 }
 0x209   : > { %1249 = vst.msk [vmem:[#allocation2 + $0x48] sm:$0xff] %vm1239_vm9, %v1162_v23  ;;  %1203 = vrot.lane.b32.xlu1 %v237_v62, %s2354_s5 }
 0x20a   : > { %1171 = vrot.lane.b32.xlu0 %v2573_v42, %s2354_s5 }
 0x20b   : > { %v1327_v38 = vpop.permute.xlu1 %1326 }
 0x20c   : > { %1399 = vst.msk [vmem:[#allocation2 + $0xc0] sm:$0xff] %vm1374_vm10, %v1327_v38  ;;  %v1295_v50 = vpop.permute.xlu0 %1294 }
 0x20d   : > { %1383 = vst.msk [vmem:[#allocation2 + $0x40] sm:$0xff] %vm1374_vm10, %v1295_v50  ;;  %1205 = vrot.lane.b32.xlu1 %v238_v4, %s2354_s5 }
 0x20e   : > { %1173 = vrot.lane.b32.xlu0 %v2570_v41, %s2354_s5  ;;  %s1954_s5 = sshll.u32 %s3713_s3, 4  ;;  %s3784_s5 = int_to_ptr.vmem [resolvable:$true] %s1954_s5 }
 0x20f   : > { %v931_v26 = vpop.permute.xlu1 %930  ;;  %s2269_s15 = scalar_lea.vmem %s3784_s5, 4096  ;;  %p2276_p1 = scmp.lt.s32.totalorder %s3784_s5, %s2274_s18 }
 0x210   : > { %1001 = vst.msk [vmem:[#allocation2 + $0xd0] sm:$0xff] %vm974_vm7, %v931_v26  ;;  %v899_v42 = vpop.permute.xlu0 %898  ;;  %p2270_p12 = scmp.ne.s32.totalorder %s3784_s5, %s2269_s15  ;;  %p2277_p2 = scmp.lt.s32.totalorder %s2275_s20, %s2269_s15 }
 0x211   : > { %985 = vst.msk [vmem:[#allocation2 + $0x50] sm:$0xff] %vm974_vm7, %v899_v42  ;;  %1338 = vrot.lane.b32.xlu1 %v1275_v61, %s2355_s6 }
 0x212   : > { %1306 = vrot.lane.b32.xlu0 %v3942_v13, %s2355_s6  ;;  %p2271_p13 = pnand %p2270_p12, %p2414_p4  ;;  %p2278_p3 = por %p2277_p2, %p2276_p1 }
 0x213   : > { %v1329_v52 = vpop.permute.xlu1 %1328 }
 0x214   : > { %1400 = vst.msk [vmem:[#allocation2 + $0xc8] sm:$0xff] %vm1374_vm10, %v1329_v52  ;;  %v1297_v41 = vpop.permute.xlu0 %1296  ;;  %p2272_p0 = pneg %p2271_p13 }
 0x215   : > { %1384 = vst.msk [vmem:[#allocation2 + $0x48] sm:$0xff] %vm1374_vm10, %v1297_v41  ;;  %1340 = vrot.lane.b32.xlu1 %v1277_v1, %s2355_s6 }
 0x216   : > { %1308 = vrot.lane.b32.xlu0 %v2744_v60, %s2355_s6  ;;  %p2279_p5 = pnand %p2278_p3, %p2272_p0 }
 0x217   : > { %v1461_v30 = vpop.permute.xlu1 %1460 }
 0x218   : > { %1533 = vst.msk [vmem:[#allocation2 + $0xc0] sm:$0xff] %vm1508_vm11, %v1461_v30  ;;  %v1429_v13 = vpop.permute.xlu0 %1428 }
 0x219   : > { %1517 = vst.msk [vmem:[#allocation2 + $0x40] sm:$0xff] %vm1508_vm11, %v1429_v13  ;;  %1472 = vrot.lane.b32.xlu1 %v1409_v47, %s2356_s25 }
 0x21a   : > { %1440 = vrot.lane.b32.xlu0 %v2966_v9, %s2356_s25 }
 0x21b   : > { %v933_v16 = vpop.permute.xlu1 %932 }
 0x21c   : > { %1002 = vst.msk [vmem:[#allocation2 + $0xd8] sm:$0xff] %vm974_vm7, %v933_v16  ;;  %v901_v60 = vpop.permute.xlu0 %900 }
 0x21d   : > { %986 = vst.msk [vmem:[#allocation2 + $0x58] sm:$0xff] %vm974_vm7, %v901_v60  ;;  %1474 = vrot.lane.b32.xlu1 %v1411_v58, %s2356_s25 }
 0x21e   : > { %1442 = vrot.lane.b32.xlu0 %v2961_v7, %s2356_s25 }
 0x21f   : > { %v1065_v45 = vpop.permute.xlu1 %1064  ;;  %v1565_v29 = vld [vmem:[#allocation2 + $0xc0] sm:$0xff] }
 0x220   : > { %1135 = vst.msk [vmem:[#allocation2 + $0xd0] sm:$0xff] %vm1108_vm8, %v1065_v45  ;;  %v1033_v6 = vpop.permute.xlu0 %1032  ;;  %v1549_v57 = vld [vmem:[#allocation2 + $0x40] sm:$0xff]  ;;  %2178 = vmatprep.mubr.msk.f32.mxu1 %vm1578_vm12, %v1565_v29 }
 0x221   : > { %1119 = vst.msk [vmem:[#allocation2 + $0x50] sm:$0xff] %vm1108_vm8, %v1033_v6  ;;  %2154 = vmatprep.mubr.msk.f32.mxu0 %vm1578_vm12, %v1549_v57 }
 0x223   : > { %v1463_v9 = vpop.permute.xlu1 %1462 }
 0x224   : > { %1534 = vst.msk [vmem:[#allocation2 + $0xc8] sm:$0xff] %vm1508_vm11, %v1463_v9  ;;  %v1431_v33 = vpop.permute.xlu0 %1430 }
 0x225   : > { %1518 = vst.msk [vmem:[#allocation2 + $0x48] sm:$0xff] %vm1508_vm11, %v1431_v33 }
 0x227   : > { %v1067_v39 = vpop.permute.xlu1 %1066 }
 0x228   : > { %1136 = vst.msk [vmem:[#allocation2 + $0xd8] sm:$0xff] %vm1108_vm8, %v1067_v39  ;;  %v1035_v7 = vpop.permute.xlu0 %1034 }
 0x229   : > { %1120 = vst.msk [vmem:[#allocation2 + $0x58] sm:$0xff] %vm1108_vm8, %v1035_v7 }
 0x22b   : > { %v1196_v10 = vpop.permute.xlu1 %1195  ;;  %v1566_v8 = vld [vmem:[#allocation2 + $0xc8] sm:$0xff] }
 0x22c   : > { %1266 = vst.msk [vmem:[#allocation2 + $0xd0] sm:$0xff] %vm1239_vm9, %v1196_v10  ;;  %v1164_v40 = vpop.permute.xlu0 %1163  ;;  %v1550_v36 = vld [vmem:[#allocation2 + $0x48] sm:$0xff]  ;;  %2179 = vmatmul.mubr.msk.f32.gmra.mrb[8].mxu1 %vm1578_vm12, %v1566_v8 }
 0x22d   : > { %1250 = vst.msk [vmem:[#allocation2 + $0x50] sm:$0xff] %vm1239_vm9, %v1164_v40  ;;  %2155 = vmatmul.mubr.msk.f32.gmra.mrb[8].mxu0 %vm1578_vm12, %v1550_v36 }
 0x22f   : > { %v1198_v59 = vpop.permute.xlu1 %1197 }
 0x230   : > { %1267 = vst.msk [vmem:[#allocation2 + $0xd8] sm:$0xff] %vm1239_vm9, %v1198_v59  ;;  %v1166_v34 = vpop.permute.xlu0 %1165 }
 0x231   : > { %1251 = vst.msk [vmem:[#allocation2 + $0x58] sm:$0xff] %vm1239_vm9, %v1166_v34 }
 0x233   : > { %v1331_v37 = vpop.permute.xlu1 %1330 }
 0x234   : > { %1401 = vst.msk [vmem:[#allocation2 + $0xd0] sm:$0xff] %vm1374_vm10, %v1331_v37  ;;  %v1299_v53 = vpop.permute.xlu0 %1298 }
 0x235   : > { %1385 = vst.msk [vmem:[#allocation2 + $0x50] sm:$0xff] %vm1374_vm10, %v1299_v53 }
 0x237   : > { %v935_v17 = vpop.permute.xlu1 %934 }
 0x238   : > { %1003 = vst.msk [vmem:[#allocation2 + $0xe0] sm:$0xff] %vm974_vm7, %v935_v17  ;;  %v903_v56 = vpop.permute.xlu0 %902 }
 0x239   : > { %987 = vst.msk [vmem:[#allocation2 + $0x60] sm:$0xff] %vm974_vm7, %v903_v56 }
 0x23b   : > { %v1333_v28 = vpop.permute.xlu1 %1332 }
 0x23c   : > { %1402 = vst.msk [vmem:[#allocation2 + $0xd8] sm:$0xff] %vm1374_vm10, %v1333_v28  ;;  %v1301_v2 = vpop.permute.xlu0 %1300 }
 0x23d   : > { %1386 = vst.msk [vmem:[#allocation2 + $0x58] sm:$0xff] %vm1374_vm10, %v1301_v2 }
 0x23f   : > { %v1465_v3 = vpop.permute.xlu1 %1464 }
 0x240   : > { %1535 = vst.msk [vmem:[#allocation2 + $0xd0] sm:$0xff] %vm1508_vm11, %v1465_v3  ;;  %v1433_v14 = vpop.permute.xlu0 %1432 }
 0x241   : > { %1519 = vst.msk [vmem:[#allocation2 + $0x50] sm:$0xff] %vm1508_vm11, %v1433_v14 }
 0x243   : > { %v937_v21 = vpop.permute.xlu1 %936 }
 0x244   : > { %1004 = vst.msk [vmem:[#allocation2 + $0xe8] sm:$0xff] %vm974_vm7, %v937_v21  ;;  %v905_v55 = vpop.permute.xlu0 %904 }
 0x245   : > { %988 = vst.msk [vmem:[#allocation2 + $0x68] sm:$0xff] %vm974_vm7, %v905_v55 }
 0x247   : > { %v1069_v24 = vpop.permute.xlu1 %1068  ;;  %v1567_v12 = vld [vmem:[#allocation2 + $0xd0] sm:$0xff] }
 0x248   : > { %1137 = vst.msk [vmem:[#allocation2 + $0xe0] sm:$0xff] %vm1108_vm8, %v1069_v24  ;;  %v1037_v54 = vpop.permute.xlu0 %1036  ;;  %v1551_v44 = vld [vmem:[#allocation2 + $0x50] sm:$0xff]  ;;  %2181 = vmatprep.mubr.msk.f32.mxu1 %vm1578_vm12, %v1567_v12 }
 0x249   : > { %1121 = vst.msk [vmem:[#allocation2 + $0x60] sm:$0xff] %vm1108_vm8, %v1037_v54  ;;  %2157 = vmatprep.mubr.msk.f32.mxu0 %vm1578_vm12, %v1551_v44 }
 0x24b   : > { %v1467_v43 = vpop.permute.xlu1 %1466 }
 0x24c   : > { %1536 = vst.msk [vmem:[#allocation2 + $0xd8] sm:$0xff] %vm1508_vm11, %v1467_v43  ;;  %v1435_v11 = vpop.permute.xlu0 %1434 }
 0x24d   : > { %1520 = vst.msk [vmem:[#allocation2 + $0x58] sm:$0xff] %vm1508_vm11, %v1435_v11 }
 0x24f   : > { %v1071_v25 = vpop.permute.xlu1 %1070 }
 0x250   : > { %1138 = vst.msk [vmem:[#allocation2 + $0xe8] sm:$0xff] %vm1108_vm8, %v1071_v25  ;;  %v1039_v27 = vpop.permute.xlu0 %1038 }
 0x251   : > { %1122 = vst.msk [vmem:[#allocation2 + $0x68] sm:$0xff] %vm1108_vm8, %v1039_v27 }
 0x253   : > { %v1200_v22 = vpop.permute.xlu1 %1199  ;;  %v1568_v35 = vld [vmem:[#allocation2 + $0xd8] sm:$0xff] }
 0x254   : > { %1268 = vst.msk [vmem:[#allocation2 + $0xe0] sm:$0xff] %vm1239_vm9, %v1200_v22  ;;  %v1168_v32 = vpop.permute.xlu0 %1167  ;;  %v1552_v63 = vld [vmem:[#allocation2 + $0x58] sm:$0xff]  ;;  %2182 = vmatmul.mubr.msk.f32.gmra.mrb[10].mxu1 %vm1578_vm12, %v1568_v35 }
 0x255   : > { %1252 = vst.msk [vmem:[#allocation2 + $0x60] sm:$0xff] %vm1239_vm9, %v1168_v32  ;;  %2158 = vmatmul.mubr.msk.f32.gmra.mrb[10].mxu0 %vm1578_vm12, %v1552_v63 }
 0x257   : > { %v1202_v15 = vpop.permute.xlu1 %1201 }
 0x258   : > { %1269 = vst.msk [vmem:[#allocation2 + $0xe8] sm:$0xff] %vm1239_vm9, %v1202_v15  ;;  %v1170_v20 = vpop.permute.xlu0 %1169 }
 0x259   : > { %1253 = vst.msk [vmem:[#allocation2 + $0x68] sm:$0xff] %vm1239_vm9, %v1170_v20 }
 0x25b   : > { %v1335_v31 = vpop.permute.xlu1 %1334 }
 0x25c   : > { %1403 = vst.msk [vmem:[#allocation2 + $0xe0] sm:$0xff] %vm1374_vm10, %v1335_v31  ;;  %v1303_v62 = vpop.permute.xlu0 %1302 }
 0x25d   : > { %1387 = vst.msk [vmem:[#allocation2 + $0x60] sm:$0xff] %vm1374_vm10, %v1303_v62 }
 0x25f   : > { %v939_v5 = vpop.permute.xlu1 %938  ;;  %v2168_v4 = vpop.f32.mrb[0].mxu1 }
 0x260   : > { %1005 = vst.msk [vmem:[#allocation2 + $0xf0] sm:$0xff] %vm974_vm7, %v939_v5  ;;  %1921 = vst [vmem:[%s3713_s3 + $0x88] sm:$0xff] %v2168_v4  ;;  %v907_v23 = vpop.permute.xlu0 %906  ;;  %v2144_v51 = vpop.f32.mrb[0].mxu0 }
 0x261   : > { %989 = vst.msk [vmem:[#allocation2 + $0x70] sm:$0xff] %vm974_vm7, %v907_v23  ;;  %1905 = vst [vmem:[%s3713_s3 + $0x8] sm:$0xff] %v2144_v51  ;;  %v1745_v0 = vpop.f32.mrb[1].mxu0  ;;  %v1825_v38 = vpop.f32.mrb[1].mxu1 }
 0x262   : > { %1904 = vst [vmem:[%s3713_s3] sm:$0xff] %v1745_v0  ;;  %1920 = vst [vmem:[%s3713_s3 + $0x80] sm:$0xff] %v1825_v38 }
 0x263   : > { %v1337_v19 = vpop.permute.xlu1 %1336 }
 0x264   : > { %1404 = vst.msk [vmem:[#allocation2 + $0xe8] sm:$0xff] %vm1374_vm10, %v1337_v19  ;;  %v1305_v50 = vpop.permute.xlu0 %1304 }
 0x265   : > { %1388 = vst.msk [vmem:[#allocation2 + $0x68] sm:$0xff] %vm1374_vm10, %v1305_v50 }
 0x267   : > { %v1469_v61 = vpop.permute.xlu1 %1468 }
 0x268   : > { %1537 = vst.msk [vmem:[#allocation2 + $0xe0] sm:$0xff] %vm1508_vm11, %v1469_v61  ;;  %v1437_v49 = vpop.permute.xlu0 %1436 }
 0x269   : > { %1521 = vst.msk [vmem:[#allocation2 + $0x60] sm:$0xff] %vm1508_vm11, %v1437_v49 }
 0x26b   : > { %v941_v26 = vpop.permute.xlu1 %940 }
 0x26c   : > { %1006 = vst.msk [vmem:[#allocation2 + $0xf8] sm:$0xff] %vm974_vm7, %v941_v26  ;;  %v909_v42 = vpop.permute.xlu0 %908 }
 0x26d   : > { %990 = vst.msk [vmem:[#allocation2 + $0x78] sm:$0xff] %vm974_vm7, %v909_v42 }
 0x26f   : > { %v1073_v18 = vpop.permute.xlu1 %1072  ;;  %v1569_v46 = vld [vmem:[#allocation2 + $0xe0] sm:$0xff] }
 0x270   : > { %1139 = vst.msk [vmem:[#allocation2 + $0xf0] sm:$0xff] %vm1108_vm8, %v1073_v18  ;;  %v1041_v1 = vpop.permute.xlu0 %1040  ;;  %v1553_v52 = vld [vmem:[#allocation2 + $0x60] sm:$0xff]  ;;  %2184 = vmatprep.mubr.msk.f32.mxu1 %vm1578_vm12, %v1569_v46 }
 0x271   : > { %1123 = vst.msk [vmem:[#allocation2 + $0x70] sm:$0xff] %vm1108_vm8, %v1041_v1  ;;  %2160 = vmatprep.mubr.msk.f32.mxu0 %vm1578_vm12, %v1553_v52 }
 0x273   : > { %v1471_v41 = vpop.permute.xlu1 %1470 }
 0x274   : > { %1538 = vst.msk [vmem:[#allocation2 + $0xe8] sm:$0xff] %vm1508_vm11, %v1471_v41  ;;  %v1439_v47 = vpop.permute.xlu0 %1438 }
 0x275   : > { %1522 = vst.msk [vmem:[#allocation2 + $0x68] sm:$0xff] %vm1508_vm11, %v1439_v47 }
 0x277   : > { %v1075_v48 = vpop.permute.xlu1 %1074 }
 0x278   : > { %1140 = vst.msk [vmem:[#allocation2 + $0xf8] sm:$0xff] %vm1108_vm8, %v1075_v48  ;;  %v1043_v30 = vpop.permute.xlu0 %1042 }
 0x279   : > { %1124 = vst.msk [vmem:[#allocation2 + $0x78] sm:$0xff] %vm1108_vm8, %v1043_v30 }
 0x27b   : > { %v1204_v13 = vpop.permute.xlu1 %1203  ;;  %v1570_v58 = vld [vmem:[#allocation2 + $0xe8] sm:$0xff] }
 0x27c   : > { %1270 = vst.msk [vmem:[#allocation2 + $0xf0] sm:$0xff] %vm1239_vm9, %v1204_v13  ;;  %v1172_v16 = vpop.permute.xlu0 %1171  ;;  %v1554_v60 = vld [vmem:[#allocation2 + $0x68] sm:$0xff]  ;;  %2185 = vmatmul.mubr.msk.f32.gmra.mrb[12].mxu1 %vm1578_vm12, %v1570_v58 }
 0x27d   : > { %1254 = vst.msk [vmem:[#allocation2 + $0x70] sm:$0xff] %vm1239_vm9, %v1172_v16  ;;  %2161 = vmatmul.mubr.msk.f32.gmra.mrb[12].mxu0 %vm1578_vm12, %v1554_v60 }
 0x27f   : > { %v1206_v45 = vpop.permute.xlu1 %1205 }
 0x280   : > { %1271 = vst.msk [vmem:[#allocation2 + $0xf8] sm:$0xff] %vm1239_vm9, %v1206_v45  ;;  %v1174_v29 = vpop.permute.xlu0 %1173 }
 0x281   : > { %1255 = vst.msk [vmem:[#allocation2 + $0x78] sm:$0xff] %vm1239_vm9, %v1174_v29 }
 0x283   : > { %v1339_v6 = vpop.permute.xlu1 %1338 }
 0x284   : > { %1405 = vst.msk [vmem:[#allocation2 + $0xf0] sm:$0xff] %vm1374_vm10, %v1339_v6  ;;  %v1307_v57 = vpop.permute.xlu0 %1306 }
 0x285   : > { %1389 = vst.msk [vmem:[#allocation2 + $0x70] sm:$0xff] %vm1374_vm10, %v1307_v57 }
 0x287   : > { %v1341_v9 = vpop.permute.xlu1 %1340  ;;  %v2171_v33 = vpop.f32.mrb[2].mxu1 }
 0x288   : > { %1406 = vst.msk [vmem:[#allocation2 + $0xf8] sm:$0xff] %vm1374_vm10, %v1341_v9  ;;  %1923 = vst [vmem:[%s3713_s3 + $0x98] sm:$0xff] %v2171_v33  ;;  %v1309_v39 = vpop.permute.xlu0 %1308  ;;  %v2147_v7 = vpop.f32.mrb[2].mxu0 }
 0x289   : > { %1390 = vst.msk [vmem:[#allocation2 + $0x78] sm:$0xff] %vm1374_vm10, %v1309_v39  ;;  %1907 = vst [vmem:[%s3713_s3 + $0x18] sm:$0xff] %v2147_v7  ;;  %v1755_v10 = vpop.f32.mrb[3].mxu0  ;;  %v1835_v8 = vpop.f32.mrb[3].mxu1 }
 0x28a   : > { %1906 = vst [vmem:[%s3713_s3 + $0x10] sm:$0xff] %v1755_v10  ;;  %1922 = vst [vmem:[%s3713_s3 + $0x90] sm:$0xff] %v1835_v8 }
 0x28b   : > { %v1473_v40 = vpop.permute.xlu1 %1472 }
 0x28c   : > { %1539 = vst.msk [vmem:[#allocation2 + $0xf0] sm:$0xff] %vm1508_vm11, %v1473_v40  ;;  %v1441_v36 = vpop.permute.xlu0 %1440 }
 0x28d   : > { %1523 = vst.msk [vmem:[#allocation2 + $0x70] sm:$0xff] %vm1508_vm11, %v1441_v36 }
 0x28f   : > { %v1475_v59 = vpop.permute.xlu1 %1474 }
 0x290   : > { %1540 = vst.msk [vmem:[#allocation2 + $0xf8] sm:$0xff] %vm1508_vm11, %v1475_v59  ;;  %v1443_v34 = vpop.permute.xlu0 %1442 }
 0x291   : > { %1524 = vst.msk [vmem:[#allocation2 + $0x78] sm:$0xff] %vm1508_vm11, %v1443_v34 }
 0x293   : > { %v1571_v37 = vld [vmem:[#allocation2 + $0xf0] sm:$0xff] }
 0x294   : > { %v1555_v53 = vld [vmem:[#allocation2 + $0x70] sm:$0xff]  ;;  %2187 = vmatprep.mubr.msk.f32.mxu1 %vm1578_vm12, %v1571_v37 }
 0x295   : > { %2163 = vmatprep.mubr.msk.f32.mxu0 %vm1578_vm12, %v1555_v53 }
 0x297   : > { %v1572_v17 = vld [vmem:[#allocation2 + $0xf8] sm:$0xff] }
 0x298   : > { %v1556_v56 = vld [vmem:[#allocation2 + $0x78] sm:$0xff]  ;;  %2188 = vmatmul.mubr.msk.f32.gmra.mrb[14].mxu1 %vm1578_vm12, %v1572_v17 }
 0x299   : > { %2164 = vmatmul.mubr.msk.f32.gmra.mrb[14].mxu0 %vm1578_vm12, %v1556_v56 }
 0x2af   : > { %v2174_v28 = vpop.f32.mrb[4].mxu1 }
 0x2b0   : > { %v2150_v2 = vpop.f32.mrb[4].mxu0  ;;  %1925 = vst [vmem:[%s3713_s3 + $0xa8] sm:$0xff] %v2174_v28  ;;  %v1845_v3 = vpop.f32.mrb[5].mxu1 }
 0x2b1   : > { %1909 = vst [vmem:[%s3713_s3 + $0x28] sm:$0xff] %v2150_v2  ;;  %v1765_v14 = vpop.f32.mrb[5].mxu0  ;;  %1924 = vst [vmem:[%s3713_s3 + $0xa0] sm:$0xff] %v1845_v3 }
 0x2b2   : > { %1908 = vst [vmem:[%s3713_s3 + $0x20] sm:$0xff] %v1765_v14 }
 0x2d7   : > { %v2177_v21 = vpop.f32.mrb[6].mxu1 }
 0x2d8   : > { %v2153_v55 = vpop.f32.mrb[6].mxu0  ;;  %1927 = vst [vmem:[%s3713_s3 + $0xb8] sm:$0xff] %v2177_v21  ;;  %v1855_v24 = vpop.f32.mrb[7].mxu1 }
 0x2d9   : > { %1911 = vst [vmem:[%s3713_s3 + $0x38] sm:$0xff] %v2153_v55  ;;  %v1775_v12 = vpop.f32.mrb[7].mxu0  ;;  %1926 = vst [vmem:[%s3713_s3 + $0xb0] sm:$0xff] %v1855_v24 }
 0x2da   : > { %1910 = vst [vmem:[%s3713_s3 + $0x30] sm:$0xff] %v1775_v12 }
 0x2ff   : > { %v2180_v54 = vpop.f32.mrb[8].mxu1 }
 0x300   : > { %v2156_v44 = vpop.f32.mrb[8].mxu0  ;;  %1929 = vst [vmem:[%s3713_s3 + $0xc8] sm:$0xff] %v2180_v54  ;;  %v1865_v43 = vpop.f32.mrb[9].mxu1 }
 0x301   : > { %1913 = vst [vmem:[%s3713_s3 + $0x48] sm:$0xff] %v2156_v44  ;;  %v1785_v11 = vpop.f32.mrb[9].mxu0  ;;  %1928 = vst [vmem:[%s3713_s3 + $0xc0] sm:$0xff] %v1865_v43 }
 0x302   : > { %1912 = vst [vmem:[%s3713_s3 + $0x40] sm:$0xff] %v1785_v11 }
 0x327   : > { %v2183_v25 = vpop.f32.mrb[10].mxu1 }
 0x328   : > { %v2159_v27 = vpop.f32.mrb[10].mxu0  ;;  %1931 = vst [vmem:[%s3713_s3 + $0xd8] sm:$0xff] %v2183_v25  ;;  %v1875_v22 = vpop.f32.mrb[11].mxu1 }
 0x329   : > { %1915 = vst [vmem:[%s3713_s3 + $0x58] sm:$0xff] %v2159_v27  ;;  %v1795_v35 = vpop.f32.mrb[11].mxu0  ;;  %1930 = vst [vmem:[%s3713_s3 + $0xd0] sm:$0xff] %v1875_v22 }
 0x32a   : > { %1914 = vst [vmem:[%s3713_s3 + $0x50] sm:$0xff] %v1795_v35 }
 0x34f   : > { %v2186_v32 = vpop.f32.mrb[12].mxu1 }
 0x350   : > { %v2162_v63 = vpop.f32.mrb[12].mxu0  ;;  %1933 = vst [vmem:[%s3713_s3 + $0xe8] sm:$0xff] %v2186_v32  ;;  %v1885_v15 = vpop.f32.mrb[13].mxu1 }
 0x351   : > { %1917 = vst [vmem:[%s3713_s3 + $0x68] sm:$0xff] %v2162_v63  ;;  %v1805_v20 = vpop.f32.mrb[13].mxu0  ;;  %1932 = vst [vmem:[%s3713_s3 + $0xe0] sm:$0xff] %v1885_v15 }
 0x352   : > { %1916 = vst [vmem:[%s3713_s3 + $0x60] sm:$0xff] %v1805_v20 }
 0x36b   : > { %v2189_v31 = vpop.f32.mrb[14].mxu1 }
 0x36c   : > { %v2165_v62 = vpop.f32.mrb[14].mxu0  ;;  %1935 = vst [vmem:[%s3713_s3 + $0xf8] sm:$0xff] %v2189_v31  ;;  %v1895_v5 = vpop.f32.mrb[15].mxu1 }
 0x36d   : > { %1919 = vst [vmem:[%s3713_s3 + $0x78] sm:$0xff] %v2165_v62  ;;  %v1815_v4 = vpop.f32.mrb[15].mxu0  ;;  %1934 = vst [vmem:[%s3713_s3 + $0xf0] sm:$0xff] %v1895_v5 }
 0x36e   : > { %1918 = vst [vmem:[%s3713_s3 + $0x70] sm:$0xff] %v1815_v4 }
 0x36f   : > { %2282 = shalt.err (!%p2279_p5)
}
 0x370   : > { %s2283_s23 = scalar_lea.hbm %s3781_s8, 4096  ;;  %s2287_s26 = scalar_lea.hbm %s3840_s2, 8192 }
 0x371   : > { %p2284_p6 = scmp.ne.s32.totalorder %s3781_s8, %s2283_s23  ;;  %p2288_p10 = scmp.lt.u32.totalorder %s3781_s8, %s3840_s2 }
 0x372   : > { %p2289_p11 = scmp.lt.u32.totalorder %s2287_s26, %s2283_s23  ;;  %p2291_p13 = scmp.lt.u32.totalorder %s2283_s23, %s3781_s8 }
 0x373   : > { %p2285_p7 = pnand %p2284_p6, %p2414_p4 }
 0x374   : > { %p2290_p12 = por %p2289_p11, %p2288_p10 }
 0x375   : > { %p2286_p9 = pneg %p2285_p7 }
 0x376   : > { %p2292_p0 = por %p2291_p13, %p2290_p12 }
 0x378   : > { %p2293_p1 = pnand %p2292_p0, %p2286_p9 }
 0x37a   : > { %2296 = shalt.err (!%p2293_p1)
}
 0x37b   : > { %s2358_s30 = smov 128  }
 0x37c   : > { %2205 = dma.vmem_to_hbm [thread:$0]  (%p2414_p4), %s3784_s5, 4096, %s3781_s8, %s3791_s12, %s2358_s30, %s2358_s30, %s2350_s29  }
 0x37d PF: > { %p2211_p2 = scmp.ge.s32.totalorder %s2347_s14, 2  ;;  %s1969_s3 = sand.u32 1, %s2327_s9  }
 0x37e   : > { %s1970_s4 = scalar_lea.sflag [#allocation4], %s1969_s3 }
 0x37f   : > { %p2208_p3 = pnand %p2211_p2, %p2421_p8 }
 0x381   : > { %2322 = dma.done.wait (!%p2208_p3), %s1970_s4, 4096  }
 0x382   : > { %2324 = vsyncadd (!%p2208_p3), %s1970_s4, 4294963200  ;;  %s15_s14 = sadd.s32 1, %s2347_s14   ;;  %s3975_s9 = smov %s2331_s10 }
 0x383   : > { %p12_p5 = scmp.ge.s32.totalorder %s15_s14, 4   ;;  %s3976_s10 = smov %s2335_s11 }
 0x384   : > { %s3977_s11 = smov %s2427_s22  ;;  %s3978_s12 = smov %s2343_s13 }
 0x385   : > { %s3979_s13 = smov %s3981_s17  ;;  %14 = sbr.rel (!%p12_p5) target bundleno = 4 (0x4), region = 67 }
 0x38c   :  { %1975 = vsyncpa [#allocation4], 1 }
 0x38d   :  { %1977 = vsyncpa [#allocation4 + $0x1], 1 }

</bundles_post_ra>
